<compile_context>
chip_gen: v5e
topology: v5e:2x2
jax: 0.10.0
libtpu: 0.0.40
codegen_flags: <defaults>
</compile_context>

<pallas_src>
import functools

import jax
import jax.numpy as jnp
from jax import lax
from jax.experimental import pallas as pl
from jax.experimental.pallas import tpu as pltpu


# ---------------------------------------------------------------------------
# Kernel
# ---------------------------------------------------------------------------
def lk_encoder_kernel(alpha_ref, x_ref, w_ref, o_ref, *, depth, kd_taps,
                      batch_block):
    # alpha_ref: SMEM (1,)               f32   PReLU slope (scalar prefetch)
    # x_ref:     VMEM (B, Dp, H*W*C)     bf16  D-halo-padded input slab(s)
    # w_ref:     VMEM (K*H*W*C, H*W*C)   bf16  folded + banded 5x5x5 weight
    # o_ref:     VMEM (B, D, H*W*C)      bf16  lane-dense output block
    rows = []
    for b in range(batch_block):                      # static Python loop
        # K sublane-range slices, lane-concatenated -> (D, K*H*W*C).
        taps = [x_ref[b, kd:kd + depth, :] for kd in range(kd_taps)]
        rows.append(jnp.concatenate(taps, axis=-1))
    # Stack batch elements along sublanes -> (B*D, K*H*W*C): M = B*D.
    lhs = rows[0] if batch_block == 1 else jnp.concatenate(rows, axis=0)

    # One deep MXU matmul, f32 accumulation.
    acc = jnp.dot(lhs, w_ref[...], preferred_element_type=jnp.float32)

    # PReLU in f32, single cast on store (bf16 writeback).
    alpha = alpha_ref[0]
    out = jnp.where(acc >= 0.0, acc, alpha * acc)
    o_ref[...] = out.reshape(batch_block, depth, -1).astype(o_ref.dtype)


# ---------------------------------------------------------------------------
# Wrapper
# ---------------------------------------------------------------------------
def _tensorcores_per_chip():
    """Best effort: 2 for chips with 2 TCs / megacore (v7x, v4, v5p), else 1."""
    try:
        kind = jax.devices()[0].device_kind.lower()
    except Exception:
        return 1
    if any(tag in kind for tag in ("v7", "7x", "v4", "v5p")):
        return 2
    return 1


def _pick_batch_block(n):
    cores = _tensorcores_per_chip()
    if cores >= 2 and n >= 2 and n % 2 == 0:
        return n // 2      # 'parallel' grid axis splits the batch across the 2 TCs
    return n               # single TC: fuse the whole batch, M = N*D, grid=(1,)


def lk_encoder_forward(x_ncdhw, w_banded, alpha, *, batch_block=None):
    """x_ncdhw: (N,C,D,H,W) f32; w_banded: (K, H*W*C, H*W*C) bf16; alpha: (1,) f32."""
    N, C, D, H, W = x_ncdhw.shape
    col_dim = H * W * C
    K = w_banded.shape[0]
    assert w_banded.shape == (K, col_dim, col_dim), w_banded.shape
    pad = (K - 1) // 2
    Dp = D + 2 * pad

    if batch_block is None:
        batch_block = _pick_batch_block(N)
    assert N % batch_block == 0, (N, batch_block)
    B = batch_block

    # Glue: NCDHW -> NDHWC, pack (H,W,C) into the lane dim, halo-pad D only
    # (H/W padding is folded into the banded weight), cast bf16.
    # TODO(synk): fold the D-halo pad and the NCDHW->NDHWC transpose into the
    # kernel (zero-init VMEM slab + offset DMA) to save HBM round trips on
    # large volumes.
    x = jnp.transpose(x_ncdhw, (0, 2, 3, 4, 1)).reshape(N, D, col_dim)
    xp = jnp.pad(x, ((0, 0), (pad, pad), (0, 0))).astype(jnp.bfloat16)

    # Fuse the K depth taps into the contraction dim of a single 2-D weight.
    kr = K * col_dim
    w2d = w_banded.reshape(kr, col_dim)

    kernel = functools.partial(lk_encoder_kernel, depth=D, kd_taps=K,
                               batch_block=B)

    # EXECUTED work (banded matmul includes the band zeros), per review.
    flops = 2 * N * D * kr * col_dim
    bytes_accessed = xp.size * 2 + w2d.size * 2 + N * D * col_dim * 2

    # NOTE: the weight has a constant index map so it is not re-fetched per
    # grid step; a pl.Buffered(1) request would also drop its idle second
    # pipeline buffer (640 KB here) — left at the default for portability.
    out = pl.pallas_call(
        kernel,
        out_shape=jax.ShapeDtypeStruct((N, D, col_dim), jnp.bfloat16),
        grid_spec=pltpu.PrefetchScalarGridSpec(
            num_scalar_prefetch=1,                       # alpha lands in SMEM
            grid=(N // B,),
            in_specs=[
                pl.BlockSpec((B, Dp, col_dim), lambda n, a: (n, 0, 0)),
                pl.BlockSpec((kr, col_dim), lambda n, a: (0, 0)),
            ],
            out_specs=pl.BlockSpec((B, D, col_dim), lambda n, a: (n, 0, 0)),
        ),
        compiler_params=pltpu.CompilerParams(
            dimension_semantics=("parallel",),
            vmem_limit_bytes=8 * 1024 * 1024,
        ),
        cost_estimate=pl.CostEstimate(
            flops=flops, transcendentals=0, bytes_accessed=bytes_accessed),
    )(alpha, xp, w2d)

    # TODO(synk): return NDHWC (bf16) directly when the consumer accepts
    # channels-last, dropping this transpose + f32 cast.
    out = out.reshape(N, D, H, W, C).astype(jnp.float32)
    return jnp.transpose(out, (0, 4, 1, 2, 3))           # back to NCDHW


# ---------------------------------------------------------------------------
# Weight folding (host-side, once per parameter set)
# ---------------------------------------------------------------------------
def _to_khw_io(w):
    """PyTorch conv weight (O, I, kd, kh, kw) -> (kd, kh, kw, I, O)."""
    return jnp.transpose(w, (2, 3, 4, 1, 0))


def build_combined_weight(w_reg, w_large, w_one, C):
    """Fold 3x3x3, 5x5x5, 1x1x1 convs and the identity residual into one 5x5x5."""
    # The fold (identity residual via eye) requires Cout == Cin, stride 1,
    # bias=False and no batchnorm — assert instead of assuming.
    assert w_large.shape == (C, C, 5, 5, 5), w_large.shape
    assert w_reg.shape == (C, C, 3, 3, 3), w_reg.shape
    assert w_one.shape == (C, C, 1, 1, 1), w_one.shape
    w_comb = _to_khw_io(w_large)                                   # (5,5,5,Cin,Cout)
    w_comb = w_comb.at[1:4, 1:4, 1:4].add(_to_khw_io(w_reg))       # embed 3x3x3
    center = _to_khw_io(w_one)[0, 0, 0] + jnp.eye(C, dtype=w_comb.dtype)
    w_comb = w_comb.at[2, 2, 2].add(center)                        # 1x1x1 + residual
    return w_comb


def build_banded_weight(w_comb, H, W, dtype=jnp.bfloat16):
    """Fold (kh, kw, Cin) — including the H/W zero-padding — into one banded
    matrix per depth tap kd:

        Wmat[kd, (h_in, w_in, ci), (h, w, co)] = w_comb[kd, h_in-h+p, w_in-w+p, ci, co]
        (zero outside the band), built against UNPADDED H/W coordinates so the
        conv per kd is   out(D, H*W*C) += x_dpad[kd:kd+D] @ Wmat[kd].
    """
    K = w_comb.shape[0]
    C = w_comb.shape[3]
    pad = (K - 1) // 2
    band_h = (jnp.arange(H)[None, :, None]
              == jnp.arange(H)[None, None, :] + jnp.arange(K)[:, None, None] - pad
              ).astype(w_comb.dtype)                               # (K, H_in, H_out)
    band_w = (jnp.arange(W)[None, :, None]
              == jnp.arange(W)[None, None, :] + jnp.arange(K)[:, None, None] - pad
              ).astype(w_comb.dtype)                               # (K, W_in, W_out)
    wmat = jnp.einsum('axh,byw,dabio->dxyihwo', band_h, band_w, w_comb)
    return wmat.reshape(K, H * W * C, H * W * C).astype(dtype)


def _conv3d_ref(x, w, pad):
    return lax.conv_general_dilated(
        x, w, window_strides=(1, 1, 1), padding=[(pad, pad)] * 3,
        dimension_numbers=("NCDHW", "OIDHW", "NCDHW"))


# ---------------------------------------------------------------------------
if __name__ == "__main__":
    # Small shapes: batch=2, in=out channels=4, spatial 8^3 (PyTorch NCDHW).
    N, C, D, H, W = 2, 4, 8, 8, 8

    key = jax.random.PRNGKey(0)
    k1, k2, k3, kx = jax.random.split(key, 4)

    # Deterministic synthetic parameters (bias=False, batchnorm=False, PReLU 0.25).
    w_reg   = jax.random.normal(k1, (C, C, 3, 3, 3), jnp.float32) * 0.10
    w_large = jax.random.normal(k2, (C, C, 5, 5, 5), jnp.float32) * 0.05
    w_one   = jax.random.normal(k3, (C, C, 1, 1, 1), jnp.float32) * 0.10
    alpha   = jnp.array([0.25], jnp.float32)     # nn.PReLU() default slope

    x = jax.random.normal(kx, (N, C, D, H, W), jnp.float32)

    w_comb = build_combined_weight(w_reg, w_large, w_one, C)
    w_banded = build_banded_weight(w_comb, H, W, dtype=jnp.bfloat16)

    fwd = jax.jit(lk_encoder_forward)
    out = jax.block_until_ready(fwd(x, w_banded, alpha))

    # Pure-JAX f32 reference of the original forward (3 convs + residual + PReLU).
    ref = (_conv3d_ref(x, w_reg, 1) + _conv3d_ref(x, w_large, 2)
           + _conv3d_ref(x, w_one, 0) + x)
    ref = jnp.where(ref >= 0, ref, alpha[0] * ref)

    assert out.shape == (N, C, D, H, W)
    # bf16 activations/weights AND bf16 output store (f32 accumulation inside)
    # -> looser tolerance than pure f32; structural bugs would be O(1) errors.
    err = float(jnp.max(jnp.abs(out - ref)))
    assert jnp.allclose(out, ref, atol=1.5e-1, rtol=5e-2), err

    print("KERNEL_OK")
</pallas_src>

<mosaic_0001>
module attributes {stable_mosaic.version = 11 : i64} {
  func.func @lk_encoder_kernel(%arg0: i32, %arg1: memref<1xf32, #tpu.memory_space<smem>>, %arg2: memref<2x12x256xbf16, #tpu.memory_space<vmem>>, %arg3: memref<1280x256xbf16, #tpu.memory_space<vmem>>, %arg4: memref<2x8x256xbf16, #tpu.memory_space<vmem>>) attributes {dimension_semantics = [#tpu.dimension_semantics<parallel>], iteration_bounds = array<i64: 1>, scalar_prefetch = 1 : i64, scratch_operands = 0 : i64, tpu.core_type = #tpu.core_type<tc>, window_params = [{transform_indices = @transform_0, window_bounds = array<i64: 2, 12, 256>}, {pipeline_mode = #tpu.pipeline_mode<synchronous>, transform_indices = @transform_1, window_bounds = array<i64: 1280, 256>}, {transform_indices = @transform_2, window_bounds = array<i64: 2, 8, 256>}]} {
    %c0 = arith.constant 0 : index
    %c0_0 = arith.constant 0 : index
    %c0_1 = arith.constant 0 : index
    %0 = vector.load %arg2[%c0, %c0_0, %c0_1] : memref<2x12x256xbf16, #tpu.memory_space<vmem>>, vector<1x8x256xbf16>
    %1 = vector.shape_cast %0 : vector<1x8x256xbf16> to vector<8x256xbf16>
    %c0_2 = arith.constant 0 : index
    %c1 = arith.constant 1 : index
    %c0_3 = arith.constant 0 : index
    %2 = vector.load %arg2[%c0_2, %c1, %c0_3] : memref<2x12x256xbf16, #tpu.memory_space<vmem>>, vector<1x8x256xbf16>
    %3 = vector.shape_cast %2 : vector<1x8x256xbf16> to vector<8x256xbf16>
    %c0_4 = arith.constant 0 : index
    %c2 = arith.constant 2 : index
    %c0_5 = arith.constant 0 : index
    %4 = vector.load %arg2[%c0_4, %c2, %c0_5] : memref<2x12x256xbf16, #tpu.memory_space<vmem>>, vector<1x8x256xbf16>
    %5 = vector.shape_cast %4 : vector<1x8x256xbf16> to vector<8x256xbf16>
    %c0_6 = arith.constant 0 : index
    %c3 = arith.constant 3 : index
    %c0_7 = arith.constant 0 : index
    %6 = vector.load %arg2[%c0_6, %c3, %c0_7] : memref<2x12x256xbf16, #tpu.memory_space<vmem>>, vector<1x8x256xbf16>
    %7 = vector.shape_cast %6 : vector<1x8x256xbf16> to vector<8x256xbf16>
    %c0_8 = arith.constant 0 : index
    %c4 = arith.constant 4 : index
    %c0_9 = arith.constant 0 : index
    %8 = vector.load %arg2[%c0_8, %c4, %c0_9] : memref<2x12x256xbf16, #tpu.memory_space<vmem>>, vector<1x8x256xbf16>
    %9 = vector.shape_cast %8 : vector<1x8x256xbf16> to vector<8x256xbf16>
    %10 = tpu.concatenate %1, %3, %5, %7, %9 in 1 : vector<8x256xbf16>, vector<8x256xbf16>, vector<8x256xbf16>, vector<8x256xbf16>, vector<8x256xbf16> -> vector<8x1280xbf16>
    %c1_10 = arith.constant 1 : index
    %c0_11 = arith.constant 0 : index
    %c0_12 = arith.constant 0 : index
    %11 = vector.load %arg2[%c1_10, %c0_11, %c0_12] : memref<2x12x256xbf16, #tpu.memory_space<vmem>>, vector<1x8x256xbf16>
    %12 = vector.shape_cast %11 : vector<1x8x256xbf16> to vector<8x256xbf16>
    %c1_13 = arith.constant 1 : index
    %c1_14 = arith.constant 1 : index
    %c0_15 = arith.constant 0 : index
    %13 = vector.load %arg2[%c1_13, %c1_14, %c0_15] : memref<2x12x256xbf16, #tpu.memory_space<vmem>>, vector<1x8x256xbf16>
    %14 = vector.shape_cast %13 : vector<1x8x256xbf16> to vector<8x256xbf16>
    %c1_16 = arith.constant 1 : index
    %c2_17 = arith.constant 2 : index
    %c0_18 = arith.constant 0 : index
    %15 = vector.load %arg2[%c1_16, %c2_17, %c0_18] : memref<2x12x256xbf16, #tpu.memory_space<vmem>>, vector<1x8x256xbf16>
    %16 = vector.shape_cast %15 : vector<1x8x256xbf16> to vector<8x256xbf16>
    %c1_19 = arith.constant 1 : index
    %c3_20 = arith.constant 3 : index
    %c0_21 = arith.constant 0 : index
    %17 = vector.load %arg2[%c1_19, %c3_20, %c0_21] : memref<2x12x256xbf16, #tpu.memory_space<vmem>>, vector<1x8x256xbf16>
    %18 = vector.shape_cast %17 : vector<1x8x256xbf16> to vector<8x256xbf16>
    %c1_22 = arith.constant 1 : index
    %c4_23 = arith.constant 4 : index
    %c0_24 = arith.constant 0 : index
    %19 = vector.load %arg2[%c1_22, %c4_23, %c0_24] : memref<2x12x256xbf16, #tpu.memory_space<vmem>>, vector<1x8x256xbf16>
    %20 = vector.shape_cast %19 : vector<1x8x256xbf16> to vector<8x256xbf16>
    %21 = tpu.concatenate %12, %14, %16, %18, %20 in 1 : vector<8x256xbf16>, vector<8x256xbf16>, vector<8x256xbf16>, vector<8x256xbf16>, vector<8x256xbf16> -> vector<8x1280xbf16>
    %22 = tpu.concatenate %10, %21 in 0 : vector<8x1280xbf16>, vector<8x1280xbf16> -> vector<16x1280xbf16>
    %c0_25 = arith.constant 0 : index
    %c0_26 = arith.constant 0 : index
    %23 = vector.load %arg3[%c0_25, %c0_26] : memref<1280x256xbf16, #tpu.memory_space<vmem>>, vector<1280x256xbf16>
    %cst = arith.constant dense<0.000000e+00> : vector<16x256xf32>
    %24 = tpu.matmul %22, %23, %cst {dimension_numbers = #tpu.dot_dimension_numbers<[1], [0], [0], [1], [0, 0, 1, 1], [], []>} : vector<16x1280xbf16>, vector<1280x256xbf16>, vector<16x256xf32> -> vector<16x256xf32>
    %c0_27 = arith.constant 0 : index
    %25 = memref.load %arg1[%c0_27] : memref<1xf32, #tpu.memory_space<smem>>
    %cst_28 = arith.constant 0.000000e+00 : f32
    %26 = vector.broadcast %cst_28 : f32 to vector<16x256xf32>
    %27 = arith.cmpf oge, %24, %26 : vector<16x256xf32>
    %28 = vector.broadcast %25 : f32 to vector<16x256xf32>
    %29 = arith.mulf %28, %24 : vector<16x256xf32>
    %30 = arith.select %27, %24, %29 : vector<16x256xi1>, vector<16x256xf32>
    %31 = vector.shape_cast %30 : vector<16x256xf32> to vector<2x8x256xf32>
    %32 = arith.truncf %31 : vector<2x8x256xf32> to vector<2x8x256xbf16>
    %c0_29 = arith.constant 0 : index
    %c0_30 = arith.constant 0 : index
    %c0_31 = arith.constant 0 : index
    %33 = vector.load %arg4[%c0_29, %c0_30, %c0_31] : memref<2x8x256xbf16, #tpu.memory_space<vmem>>, vector<2x8x256xbf16>
    tpu.vector_store %arg4[%c0_29, %c0_30, %c0_31], %32 {strides = array<i32>} : memref<2x8x256xbf16, #tpu.memory_space<vmem>>, vector<2x8x256xbf16>,
    return
  }
  func.func @transform_0(%arg0: i32, %arg1: memref<1xf32, #tpu.memory_space<smem>>) -> (i32, i32, i32) {
    %c0_i32 = arith.constant 0 : i32
    %c0_i32_0 = arith.constant 0 : i32
    %c0_i32_1 = arith.constant 0 : i32
    return %arg0, %c0_i32, %c0_i32_0 : i32, i32, i32
  }
  func.func @transform_1(%arg0: i32, %arg1: memref<1xf32, #tpu.memory_space<smem>>) -> (i32, i32) {
    %c0_i32 = arith.constant 0 : i32
    %c0_i32_0 = arith.constant 0 : i32
    %c0_i32_1 = arith.constant 0 : i32
    return %c0_i32, %c0_i32_0 : i32, i32
  }
  func.func @transform_2(%arg0: i32, %arg1: memref<1xf32, #tpu.memory_space<smem>>) -> (i32, i32, i32) {
    %c0_i32 = arith.constant 0 : i32
    %c0_i32_0 = arith.constant 0 : i32
    %c0_i32_1 = arith.constant 0 : i32
    return %arg0, %c0_i32, %c0_i32_0 : i32, i32, i32
  }
}

</mosaic_0001>

<bundles_post_ra>
// kernel: lk_encoder_forward.1
= control target key start
LH: loop header
LB: loop body
LE: loop exit
PB: predicated region body
PF: predicated region fallthrough
CT: control target
= control target key end

     0   :  { %vm152_vm0 = vcmask 1043456   ;;  %s3574_s2 = inlined_call_operand.vmem [shape: bf16[1280,256], index: 2, kind: input, shape index: {}]   ;;  %s3575_s1 = inlined_call_operand.vmem [shape: bf16[2,12,256], index: 1, kind: input, shape index: {}]   ;;  %s3576_s0 = inlined_call_operand.<no memory space> [shape: f32[1], index: 0, kind: input, shape index: {}]   ;;  %s3577_s3 = inlined_call_operand.vmem [shape: bf16[2,8,256], index: 3, kind: output, shape index: {}]  }
   0x1   :  { %v1522_v0 = vld [vmem:[%s3574_s2 + $0x70] sm:$0xf]  ;;  %v2119_v1 = vld [vmem:[%s3574_s2 + $0x74] sm:$0xf0]  ;;  %v1514_v11 = vld [vmem:[%s3574_s2 + $0x60] sm:$0xf] }
   0x2   :  { %v1586_v2 = vld [vmem:[%s3574_s2 + $0xf0] sm:$0xf]  ;;  %v1523_v3 = vor.u32 %v2119_v1, %v1522_v0  ;;  %v2135_v4 = vld [vmem:[%s3574_s2 + $0xf4] sm:$0xf0]  ;;  %v2117_v13 = vld [vmem:[%s3574_s2 + $0x64] sm:$0xf0] }
   0x3   :  { %v1650_v5 = vld [vmem:[%s3574_s2 + $0x170] sm:$0xf]  ;;  %v2151_v6 = vld [vmem:[%s3574_s2 + $0x174] sm:$0xf0]  ;;  %v1587_v7 = vor.u32 %v2135_v4, %v1586_v2  ;;  %v1578_v14 = vld [vmem:[%s3574_s2 + $0xe0] sm:$0xf]  ;;  %v1515_v16 = vor.u32 %v2117_v13, %v1514_v11 }
   0x4   :  { %v1651_v8 = vor.u32 %v2151_v6, %v1650_v5  ;;  %v1714_v9 = vld [vmem:[%s3574_s2 + $0x1f0] sm:$0xf]  ;;  %v2167_v10 = vld [vmem:[%s3574_s2 + $0x1f4] sm:$0xf0]  ;;  %1153 = vmatpush.bf16.msra.mxu0 %v1523_v3  ;;  %v2133_v15 = vld [vmem:[%s3574_s2 + $0xe4] sm:$0xf0] }
   0x5   :  { %v1715_v12 = vor.u32 %v2167_v10, %v1714_v9  ;;  %1167 = vmatpush.bf16.msra.mxu1 %v1587_v7  ;;  %v1579_v17 = vor.u32 %v2133_v15, %v1578_v14  ;;  %v1642_v18 = vld [vmem:[%s3574_s2 + $0x160] sm:$0xf]  ;;  %v2149_v19 = vld [vmem:[%s3574_s2 + $0x164] sm:$0xf0]  ;;  %v1506_v23 = vld [vmem:[%s3574_s2 + $0x50] sm:$0xf] }
   0x6   :  { %1181 = vmatpush.bf16.msra.mxu2 %v1651_v8  ;;  %v1706_v20 = vld [vmem:[%s3574_s2 + $0x1e0] sm:$0xf]  ;;  %v1643_v21 = vor.u32 %v2149_v19, %v1642_v18  ;;  %v2165_v22 = vld [vmem:[%s3574_s2 + $0x1e4] sm:$0xf0]  ;;  %v2115_v24 = vld [vmem:[%s3574_s2 + $0x54] sm:$0xf0] }
   0x7   :  { %1195 = vmatpush.bf16.msra.mxu3 %v1715_v12  ;;  %v1707_v25 = vor.u32 %v2165_v22, %v1706_v20  ;;  %v1570_v26 = vld [vmem:[%s3574_s2 + $0xd0] sm:$0xf]  ;;  %v2131_v27 = vld [vmem:[%s3574_s2 + $0xd4] sm:$0xf0]  ;;  %v1507_v29 = vor.u32 %v2115_v24, %v1506_v23  ;;  %v1498_v35 = vld [vmem:[%s3574_s2 + $0x40] sm:$0xf] }
   0x8   :  { %v1634_v28 = vld [vmem:[%s3574_s2 + $0x150] sm:$0xf]  ;;  %1154 = vmatpush.bf16.msra.mxu0 %v1515_v16  ;;  %v2147_v30 = vld [vmem:[%s3574_s2 + $0x154] sm:$0xf0]  ;;  %v1571_v33 = vor.u32 %v2131_v27, %v1570_v26  ;;  %v2113_v36 = vld [vmem:[%s3574_s2 + $0x44] sm:$0xf0] }
   0x9   :  { %v1698_v31 = vld [vmem:[%s3574_s2 + $0x1d0] sm:$0xf]  ;;  %v2163_v32 = vld [vmem:[%s3574_s2 + $0x1d4] sm:$0xf0]  ;;  %1168 = vmatpush.bf16.msra.mxu1 %v1579_v17  ;;  %v1635_v34 = vor.u32 %v2147_v30, %v1634_v28  ;;  %v1562_v37 = vld [vmem:[%s3574_s2 + $0xc0] sm:$0xf]  ;;  %v1499_v44 = vor.u32 %v2113_v36, %v1498_v35 }
   0xa   :  { %1182 = vmatpush.bf16.msra.mxu2 %v1643_v21  ;;  %v1699_v38 = vor.u32 %v2163_v32, %v1698_v31  ;;  %v2129_v39 = vld [vmem:[%s3574_s2 + $0xc4] sm:$0xf0]  ;;  %v1626_v40 = vld [vmem:[%s3574_s2 + $0x140] sm:$0xf]  ;;  %v1490_v47 = vld [vmem:[%s3574_s2 + $0x30] sm:$0xf] }
   0xb   :  { %1196 = vmatpush.bf16.msra.mxu3 %v1707_v25  ;;  %v2145_v41 = vld [vmem:[%s3574_s2 + $0x144] sm:$0xf0]  ;;  %v1690_v42 = vld [vmem:[%s3574_s2 + $0x1c0] sm:$0xf]  ;;  %v1563_v45 = vor.u32 %v2129_v39, %v1562_v37  ;;  %v2111_v48 = vld [vmem:[%s3574_s2 + $0x34] sm:$0xf0] }
   0xc   :  { %v2161_v43 = vld [vmem:[%s3574_s2 + $0x1c4] sm:$0xf0]  ;;  %1155 = vmatpush.bf16.msra.mxu0 %v1507_v29  ;;  %v1627_v46 = vor.u32 %v2145_v41, %v1626_v40  ;;  %v1554_v49 = vld [vmem:[%s3574_s2 + $0xb0] sm:$0xf]  ;;  %v2127_v51 = vld [vmem:[%s3574_s2 + $0xb4] sm:$0xf0]  ;;  %v1491_v56 = vor.u32 %v2111_v48, %v1490_v47 }
   0xd   :  { %1169 = vmatpush.bf16.msra.mxu1 %v1571_v33  ;;  %v1691_v50 = vor.u32 %v2161_v43, %v1690_v42  ;;  %v1618_v52 = vld [vmem:[%s3574_s2 + $0x130] sm:$0xf]  ;;  %v2143_v53 = vld [vmem:[%s3574_s2 + $0x134] sm:$0xf0]  ;;  %v1555_v57 = vor.u32 %v2127_v51, %v1554_v49  ;;  %v1482_v59 = vld [vmem:[%s3574_s2 + $0x20] sm:$0xf] }
   0xe   :  { %1183 = vmatpush.bf16.msra.mxu2 %v1635_v34  ;;  %v1682_v54 = vld [vmem:[%s3574_s2 + $0x1b0] sm:$0xf]  ;;  %v2159_v55 = vld [vmem:[%s3574_s2 + $0x1b4] sm:$0xf0]  ;;  %v1619_v58 = vor.u32 %v2143_v53, %v1618_v52  ;;  %v2109_v60 = vld [vmem:[%s3574_s2 + $0x24] sm:$0xf0] }
   0xf   :  { %1197 = vmatpush.bf16.msra.mxu3 %v1699_v38  ;;  %v1546_v61 = vld [vmem:[%s3574_s2 + $0xa0] sm:$0xf]  ;;  %v1683_v62 = vor.u32 %v2159_v55, %v1682_v54  ;;  %v2125_v63 = vld [vmem:[%s3574_s2 + $0xa4] sm:$0xf0]  ;;  %v1483_v4 = vor.u32 %v2109_v60, %v1482_v59  ;;  %v1474_v5 = vld [vmem:[%s3574_s2 + $0x10] sm:$0xf] }
  0x10   :  { %1156 = vmatpush.bf16.msra.mxu0 %v1499_v44  ;;  %v1610_v0 = vld [vmem:[%s3574_s2 + $0x120] sm:$0xf]  ;;  %v2141_v1 = vld [vmem:[%s3574_s2 + $0x124] sm:$0xf0]  ;;  %v1547_v6 = vor.u32 %v2125_v63, %v1546_v61  ;;  %v2107_v8 = vld [vmem:[%s3574_s2 + $0x14] sm:$0xf0] }
  0x11   :  { %1170 = vmatpush.bf16.msra.mxu1 %v1563_v45  ;;  %v1674_v2 = vld [vmem:[%s3574_s2 + $0x1a0] sm:$0xf]  ;;  %v2157_v3 = vld [vmem:[%s3574_s2 + $0x1a4] sm:$0xf0]  ;;  %v1611_v7 = vor.u32 %v2141_v1, %v1610_v0  ;;  %v1538_v9 = vld [vmem:[%s3574_s2 + $0x90] sm:$0xf]  ;;  %v1475_v18 = vor.u32 %v2107_v8, %v1474_v5 }
  0x12   :  { %1184 = vmatpush.bf16.msra.mxu2 %v1627_v46  ;;  %v2123_v10 = vld [vmem:[%s3574_s2 + $0x94] sm:$0xf0]  ;;  %v1675_v11 = vor.u32 %v2157_v3, %v1674_v2  ;;  %v1602_v12 = vld [vmem:[%s3574_s2 + $0x110] sm:$0xf]  ;;  %v1466_v16 = vld [vmem:[%s3574_s2] sm:$0xf] }
  0x13   :  { %1198 = vmatpush.bf16.msra.mxu3 %v1691_v50  ;;  %v2139_v13 = vld [vmem:[%s3574_s2 + $0x114] sm:$0xf0]  ;;  %v1666_v14 = vld [vmem:[%s3574_s2 + $0x190] sm:$0xf]  ;;  %v2105_v17 = vld [vmem:[%s3574_s2 + $0x4] sm:$0xf0]  ;;  %v1539_v23 = vor.u32 %v2123_v10, %v1538_v9 }
  0x14   :  { %1157 = vmatpush.bf16.msra.mxu0 %v1491_v56  ;;  %v2155_v15 = vld [vmem:[%s3574_s2 + $0x194] sm:$0xf0]  ;;  %v1530_v19 = vld [vmem:[%s3574_s2 + $0x80] sm:$0xf]  ;;  %v2121_v20 = vld [vmem:[%s3574_s2 + $0x84] sm:$0xf0]  ;;  %v1603_v24 = vor.u32 %v2139_v13, %v1602_v12  ;;  %v1467_v37 = vor.u32 %v2105_v17, %v1466_v16 }
  0x15   :  { %1171 = vmatpush.bf16.msra.mxu1 %v1555_v57  ;;  %v1594_v21 = vld [vmem:[%s3574_s2 + $0x100] sm:$0xf]  ;;  %v2137_v22 = vld [vmem:[%s3574_s2 + $0x104] sm:$0xf0]  ;;  %v1778_v27 = vld [vmem:[%s3574_s2 + $0x270] sm:$0xf]  ;;  %v1667_v29 = vor.u32 %v2155_v15, %v1666_v14  ;;  %v1531_v41 = vor.u32 %v2121_v20, %v1530_v19 }
  0x16   :  { %1185 = vmatpush.bf16.msra.mxu2 %v1619_v58  ;;  %v1658_v25 = vld [vmem:[%s3574_s2 + $0x180] sm:$0xf]  ;;  %v2153_v26 = vld [vmem:[%s3574_s2 + $0x184] sm:$0xf0]  ;;  %v2183_v28 = vld [vmem:[%s3574_s2 + $0x274] sm:$0xf0]  ;;  %v1595_v42 = vor.u32 %v2137_v22, %v1594_v21 }
  0x17   :  { %1199 = vmatpush.bf16.msra.mxu3 %v1683_v62  ;;  %v1842_v30 = vld [vmem:[%s3574_s2 + $0x2f0] sm:$0xf]  ;;  %v2199_v31 = vld [vmem:[%s3574_s2 + $0x2f4] sm:$0xf0]  ;;  %v2503_v36 = vld [vmem:[%s3574_s2 + $0x260] sm:$0xf]  ;;  %v1659_v46 = vor.u32 %v2153_v26, %v1658_v25  ;;  %v1779_v47 = vor.u32 %v2183_v28, %v1778_v27 }
  0x18   :  { %1158 = vmatpush.bf16.msra.mxu0 %v1483_v4  ;;  %v1906_v32 = vld [vmem:[%s3574_s2 + $0x370] sm:$0xf]  ;;  %v2215_v33 = vld [vmem:[%s3574_s2 + $0x374] sm:$0xf0]  ;;  %v2181_v38 = vld [vmem:[%s3574_s2 + $0x264] sm:$0xf0]  ;;  %v1843_v51 = vor.u32 %v2199_v31, %v1842_v30 }
  0x19   :  { %1172 = vmatpush.bf16.msra.mxu1 %v1547_v6  ;;  %v1970_v34 = vld [vmem:[%s3574_s2 + $0x3f0] sm:$0xf]  ;;  %v2231_v35 = vld [vmem:[%s3574_s2 + $0x3f4] sm:$0xf0]  ;;  %v2511_v39 = vld [vmem:[%s3574_s2 + $0x2e0] sm:$0xf]  ;;  %v1907_v52 = vor.u32 %v2215_v33, %v1906_v32  ;;  %v1771_v56 = vor.u32 %v2181_v38, %v2503_v36 }
  0x1a   :  { %1186 = vmatpush.bf16.msra.mxu2 %v1611_v7  ;;  %v2516_v40 = vld [vmem:[%s3574_s2 + $0x2e4] sm:$0xf0]  ;;  %v1898_v43 = vld [vmem:[%s3574_s2 + $0x360] sm:$0xf]  ;;  %v2537_v49 = vld [vmem:[%s3574_s2 + $0x250] sm:$0xf]  ;;  %v1971_v55 = vor.u32 %v2231_v35, %v1970_v34 }
  0x1b   :  { %1200 = vmatpush.bf16.msra.mxu3 %v1675_v11  ;;  %v2213_v44 = vld [vmem:[%s3574_s2 + $0x364] sm:$0xf0]  ;;  %v2527_v45 = vld [vmem:[%s3574_s2 + $0x3e0] sm:$0xf]  ;;  %v2542_v50 = vld [vmem:[%s3574_s2 + $0x254] sm:$0xf0]  ;;  %v1835_v57 = vor.u32 %v2516_v40, %v2511_v39 }
  0x1c   :  { %1159 = vmatpush.bf16.msra.mxu0 %v1475_v18  ;;  %v2532_v48 = vld [vmem:[%s3574_s2 + $0x3e4] sm:$0xf0]  ;;  %v2547_v53 = vld [vmem:[%s3574_s2 + $0x2d0] sm:$0xf]  ;;  %v2552_v54 = vld [vmem:[%s3574_s2 + $0x2d4] sm:$0xf0]  ;;  %v1899_v60 = vor.u32 %v2213_v44, %v1898_v43  ;;  %v1763_v62 = vor.u32 %v2542_v50, %v2537_v49 }
  0x1d   :  { %1173 = vmatpush.bf16.msra.mxu1 %v1539_v23  ;;  %v2560_v58 = vld [vmem:[%s3574_s2 + $0x350] sm:$0xf]  ;;  %v2565_v59 = vld [vmem:[%s3574_s2 + $0x354] sm:$0xf0]  ;;  %v1963_v61 = vor.u32 %v2532_v48, %v2527_v45  ;;  %v13_v63 = vld [vmem:[%s3575_s1] sm:$0xff]  ;;  %v1827_v2 = vor.u32 %v2552_v54, %v2547_v53 }
  0x1e   :  { %1187 = vmatpush.bf16.msra.mxu2 %v1603_v24  ;;  %v1455_v0 = vld [vmem:[%s3575_s1 + $0x10] sm:$0xff]  ;;  %v2580_v1 = vld [vmem:[%s3575_s1 + $0x8] sm:$0x11]  ;;  %v2592_v4 = vld [vmem:[%s3574_s2 + $0x3d4] sm:$0xf0]  ;;  %v19_v5 = vunpack.c.l.b16 %v13_v63  ;;  %v1891_v9 = vor.u32 %v2565_v59, %v2560_v58  ;;  %v20_v11 = vunpack.c.h.b16 %v13_v63 }
  0x1f   :  { %1201 = vmatpush.bf16.msra.mxu3 %v1667_v29  ;;  %v2587_v3 = vld [vmem:[%s3574_s2 + $0x3d0] sm:$0xf]  ;;  %v84_v6 = vunpack.c.l.b16 %v1455_v0  ;;  %v24_v7 = vunpack.c.l.b16 %v2580_v1  ;;  %v2598_v8 = vld [vmem:[%s3575_s1 + $0x18] sm:$0x11]  ;;  %v25_v12 = vunpack.c.h.b16 %v2580_v1  ;;  %v2607_v13 = vld [vmem:[%s3574_s2 + $0x240] sm:$0xf]  ;;  %v85_v17 = vunpack.c.h.b16 %v1455_v0 }
  0x20   :  { %1160 = vmatpush.bf16.msra.mxu0 %v1467_v37  ;;  %v89_v10 = vunpack.c.l.b16 %v2598_v8  ;;  %v21_v14 = vpack.c.b16 %v19_v5, %v19_v5  ;;  %v1955_v18 = vor.u32 %v2592_v4, %v2587_v3  ;;  %v2616_v19 = vld [vmem:[%s3574_s2 + $0x244] sm:$0xf0]  ;;  %v2621_v20 = vld [vmem:[%s3574_s2 + $0x2c0] sm:$0xf]  ;;  %v22_v22 = vpack.c.b16 %v20_v11, %v20_v11  ;;  %v2671_v43 = vld [vmem:[%s3574_s2 + $0x234] sm:$0xf0] }
  0x21   :  { %1174 = vmatpush.bf16.msra.mxu1 %v1531_v41  ;;  %v86_v15 = vpack.c.b16 %v84_v6, %v84_v6  ;;  %v26_v16 = vpack.c.b16 %v24_v7, %v19_v5  ;;  %v2628_v23 = vld [vmem:[%s3574_s2 + $0x2c4] sm:$0xf0]  ;;  %v87_v27 = vpack.c.b16 %v85_v17, %v85_v17  ;;  %v2633_v28 = vld [vmem:[%s3574_s2 + $0x340] sm:$0xf]  ;;  %v2642_v32 = vpack.c.b16 %v25_v12, %v20_v11  ;;  %v2676_v44 = vld [vmem:[%s3574_s2 + $0x2b0] sm:$0xf] }
  0x22   :  { %1188 = vmatpush.bf16.msra.mxu2 %v1595_v42  ;;  %v91_v21 = vpack.c.b16 %v89_v10, %v84_v6  ;;  %v2638_v29 = vld [vmem:[%s3574_s2 + $0x344] sm:$0xf0]  ;;  %v90_v33 = vunpack.c.h.b16 %v2598_v8  ;;  %v1755_v34 = vor.u32 %v2616_v19, %v2607_v13  ;;  %v2650_v35 = vld [vmem:[%s3574_s2 + $0x3c0] sm:$0xf]  ;;  %v1819_v40 = vor.u32 %v2628_v23, %v2621_v20  ;;  %v2666_v42 = vld [vmem:[%s3574_s2 + $0x230] sm:$0xf] }
  0x23   :  { %1202 = vmatpush.bf16.msra.mxu3 %v1659_v46  ;;  %v142_v24 = vrot.slane %v86_v15, 4  ;;  %v29_v25 = vshrl.u32 %v26_v16, 16  ;;  %v31_v26 = vshll.u32 %v26_v16, 16  ;;  %v2655_v36 = vld [vmem:[%s3574_s2 + $0x3c4] sm:$0xf0]  ;;  %v143_v39 = vrot.slane %v87_v27, 4 }
  0x24   :  { %1209 = vmatpush.bf16.msrb.mxu0 %v1779_v47  ;;  %v94_v30 = vshrl.u32 %v91_v21, 16  ;;  %v96_v31 = vshll.u32 %v91_v21, 16  ;;  %v2681_v45 = vld [vmem:[%s3574_s2 + $0x2b4] sm:$0xf0]  ;;  %v2686_v46 = vld [vmem:[%s3574_s2 + $0x330] sm:$0xf]  ;;  %v1947_v3 = vor.u32 %v2655_v36, %v2650_v35  ;;  %v1747_v19 = vor.u32 %v2671_v43, %v2666_v42 }
  0x25   :  { %1223 = vmatpush.bf16.msrb.mxu1 %v1843_v51  ;;  %v2658_v37 = vsel %vm152_vm0, %v21_v14, %v142_v24  ;;  %v33_v38 = vrot.slane %v31_v26, 1  ;;  %v2691_v47 = vld [vmem:[%s3574_s2 + $0x334] sm:$0xf0]  ;;  %v38_v48 = vshll.u32 %v2642_v32, 16  ;;  %v92_v51 = vpack.c.b16 %v90_v33, %v85_v17  ;;  %v2726_v63 = vld [vmem:[%s3574_s2 + $0x224] sm:$0xf0] }
  0x26   :  { %1237 = vmatpush.bf16.msrb.mxu2 %v1907_v52  ;;  %1161 = vmatmul.bf16.vlgmr.msra.gmra.mxu0 %v2658_v37  ;;  %v98_v41 = vrot.slane %v96_v31, 1  ;;  %v1883_v52 = vor.u32 %v2638_v29, %v2633_v28  ;;  %v2712_v58 = vsel %vm152_vm0, %v22_v22, %v143_v39  ;;  %v36_v49 = vshrl.u32 %v2642_v32, 16  ;;  %v2731_v53 = vld [vmem:[%s3574_s2 + $0x2a0] sm:$0xf]  ;;  %v2736_v54 = vld [vmem:[%s3574_s2 + $0x2a4] sm:$0xf0] }
  0x27   :  { %1251 = vmatpush.bf16.msrb.mxu3 %v1971_v55  ;;  %v34_v55 = vor.u32 %v33_v38, %v29_v25  ;;  %v40_v59 = vrot.slane %v38_v48, 1  ;;  %v2741_v0 = vld [vmem:[%s3574_s2 + $0x320] sm:$0xf]  ;;  %1175 = vmatmul.bf16.vlgmr.msra.gmra.mxu1 %v2712_v58  ;;  %v2759_v5 = vld [vmem:[%s3574_s2 + $0x3a4] sm:$0xf0]  ;;  %v1811_v20 = vor.u32 %v2681_v45, %v2676_v44  ;;  %v1875_v21 = vor.u32 %v2691_v47, %v2686_v46 }
  0x28   :  { %1210 = vmatpush.bf16.msrb.mxu0 %v1771_v56  ;;  %v2704_v56 = vld [vmem:[%s3574_s2 + $0x3b0] sm:$0xf]  ;;  %v99_v50 = vor.u32 %v98_v41, %v94_v30  ;;  %v2754_v4 = vld [vmem:[%s3574_s2 + $0x3a0] sm:$0xf]  ;;  %v2779_v13 = vld [vmem:[%s3574_s2 + $0x294] sm:$0xf0] }
  0x29   :  { %1224 = vmatpush.bf16.msrb.mxu1 %v1835_v57  ;;  %v2709_v57 = vld [vmem:[%s3574_s2 + $0x3b4] sm:$0xf0]  ;;  %v2764_v6 = vld [vmem:[%s3574_s2 + $0x210] sm:$0xf]  ;;  %v2812_v24 = vld [vmem:[%s3574_s2 + $0x200] sm:$0xf]  ;;  %v41_v27 = vor.u32 %v40_v59, %v36_v49  ;;  %v1931_v41 = vor.u32 %v2759_v5, %v2754_v4 }
  0x2a   :  { %1238 = vmatpush.bf16.msrb.mxu2 %v1899_v60  ;;  %v101_v60 = vshrl.u32 %v92_v51, 16  ;;  %v2774_v11 = vld [vmem:[%s3574_s2 + $0x290] sm:$0xf]  ;;  %v144_v14 = vrot.slane %v99_v50, 4  ;;  %v2789_v17 = vld [vmem:[%s3574_s2 + $0x314] sm:$0xf0]  ;;  %v1939_v22 = vor.u32 %v2709_v57, %v2704_v56 }
  0x2b   :  { %1252 = vmatpush.bf16.msrb.mxu3 %v1963_v61  ;;  %v103_v61 = vshll.u32 %v92_v51, 16  ;;  %v2784_v16 = vld [vmem:[%s3574_s2 + $0x310] sm:$0xf]  ;;  %v2807_v23 = vld [vmem:[%s3574_s2 + $0x394] sm:$0xf0]  ;;  %v1795_v43 = vor.u32 %v2779_v13, %v2774_v11 }
  0x2c   :  { %1211 = vmatpush.bf16.msrb.mxu0 %v1763_v62  ;;  %v2721_v62 = vld [vmem:[%s3574_s2 + $0x220] sm:$0xf]  ;;  %v2817_v25 = vld [vmem:[%s3574_s2 + $0x204] sm:$0xf0]  ;;  %v2820_v26 = vsel %vm152_vm0, %v34_v55, %v144_v14  ;;  %v1859_v44 = vor.u32 %v2789_v17, %v2784_v16  ;;  %v1457_v56 = vld [vmem:[%s3575_s1 + $0x10] sm:$0xee] }
  0x2d   :  { %1225 = vmatpush.bf16.msrb.mxu1 %v1827_v2  ;;  %v2746_v2 = vld [vmem:[%s3574_s2 + $0x324] sm:$0xf0]  ;;  %v105_v15 = vrot.slane %v103_v61, 1  ;;  %v2825_v29 = vld [vmem:[%s3574_s2 + $0x280] sm:$0xf]  ;;  %1189 = vmatmul.bf16.vlgmr.msra.gmra.mxu2 %v2820_v26  ;;  %v1739_v32 = vor.u32 %v2726_v63, %v2721_v62  ;;  %v1723_v46 = vor.u32 %v2817_v25, %v2812_v24  ;;  %v108_v59 = vunpack.c.l.b16 %v1457_v56 }
  0x2e   :  { %1239 = vmatpush.bf16.msrb.mxu2 %v1891_v9  ;;  %v2769_v9 = vld [vmem:[%s3574_s2 + $0x214] sm:$0xf0]  ;;  %v2830_v30 = vld [vmem:[%s3574_s2 + $0x284] sm:$0xf0]  ;;  %v2835_v31 = vld [vmem:[%s3574_s2 + $0x300] sm:$0xf]  ;;  %v1867_v35 = vor.u32 %v2746_v2, %v2741_v0  ;;  %v109_v2 = vunpack.c.h.b16 %v1457_v56 }
  0x2f   :  { %1253 = vmatpush.bf16.msrb.mxu3 %v1955_v18  ;;  %v2794_v18 = vld [vmem:[%s3574_s2 + $0x390] sm:$0xf]  ;;  %v106_v28 = vor.u32 %v105_v15, %v101_v60  ;;  %v2847_v36 = vld [vmem:[%s3574_s2 + $0x304] sm:$0xf0]  ;;  %v2852_v38 = vld [vmem:[%s3574_s2 + $0x380] sm:$0xf]  ;;  %v1731_v42 = vor.u32 %v2769_v9, %v2764_v6  ;;  %v1787_v47 = vor.u32 %v2830_v30, %v2825_v29  ;;  %v110_v6 = vpack.c.b16 %v89_v10, %v108_v59 }
  0x30   :  { %1212 = vmatpush.bf16.msrb.mxu0 %v1755_v34  ;;  %v1803_v34 = vor.u32 %v2736_v54, %v2731_v53  ;;  %v2857_v39 = vld [vmem:[%s3574_s2 + $0x384] sm:$0xf0]  ;;  %v1923_v45 = vor.u32 %v2807_v23, %v2794_v18  ;;  %v1851_v51 = vor.u32 %v2847_v36, %v2835_v31  ;;  %v15_v55 = vld [vmem:[%s3575_s1] sm:$0xee]  ;;  %v2889_v57 = vld [vmem:[%s3575_s1 + $0x18] sm:$0x33]  ;;  %v111_v14 = vpack.c.b16 %v90_v33, %v109_v2 }
  0x31   :  { %1226 = vmatpush.bf16.msrb.mxu1 %v1819_v40  ;;  %v145_v40 = vrot.slane %v106_v28, 4  ;;  %v2894_v49 = vld [vmem:[%s3574_s2 + $0x470] sm:$0xf]  ;;  %v43_v50 = vunpack.c.l.b16 %v15_v55  ;;  %v115_v60 = vunpack.c.l.b16 %v2889_v57  ;;  %v2900_v61 = vld [vmem:[%s3575_s1 + $0x8] sm:$0x33]  ;;  %v44_v62 = vunpack.c.h.b16 %v15_v55 }
  0x32   :  { %1240 = vmatpush.bf16.msrb.mxu2 %v1883_v52  ;;  %v1915_v52 = vor.u32 %v2857_v39, %v2852_v38  ;;  %v2906_v63 = vld [vmem:[%s3574_s2 + $0x474] sm:$0xf0]  ;;  %v2911_v53 = vld [vmem:[%s3574_s2 + $0x4f0] sm:$0xf]  ;;  %v50_v0 = vunpack.c.l.b16 %v2900_v61  ;;  %v51_v4 = vunpack.c.h.b16 %v2900_v61  ;;  %v2118_v1 = vld [vmem:[%s3574_s2 + $0x74] sm:$0xf] }
  0x33   :  { %1254 = vmatpush.bf16.msrb.mxu3 %v1947_v3  ;;  %v2874_v48 = vsel %vm152_vm0, %v41_v27, %v145_v40  ;;  %v2916_v54 = vld [vmem:[%s3574_s2 + $0x4f4] sm:$0xf0]  ;;  %v116_v3 = vunpack.c.h.b16 %v2889_v57  ;;  %v45_v5 = vpack.c.b16 %v24_v7, %v43_v50  ;;  %v117_v9 = vpack.c.b16 %v115_v60, %v108_v59  ;;  %v2134_v16 = vld [vmem:[%s3574_s2 + $0xf4] sm:$0xf]  ;;  %v2132_v29 = vld [vmem:[%s3574_s2 + $0xe4] sm:$0xf] }
  0x34   :  { %1213 = vmatpush.bf16.msrb.mxu0 %v1747_v19  ;;  %1203 = vmatmul.bf16.vlgmr.msra.gmra.mxu3 %v2874_v48  ;;  %v46_v11 = vpack.c.b16 %v25_v12, %v44_v62  ;;  %v52_v13 = vpack.c.b16 %v50_v0, %v43_v50  ;;  %v2035_v10 = vor.u32 %v2906_v63, %v2894_v49  ;;  %v1524_v12 = vld [vmem:[%s3574_s2 + $0x78] sm:$0xf0]  ;;  %v1460_v18 = vrot.slane %v110_v6, 5  ;;  %v2245_v50 = vld [vmem:[%s3574_s2 + $0x464] sm:$0xf0] }
  0x35   :  { %1227 = vmatpush.bf16.msrb.mxu1 %v1811_v20  ;;  %v118_v7 = vpack.c.b16 %v116_v3, %v109_v2  ;;  %v2099_v15 = vor.u32 %v2916_v54, %v2911_v53  ;;  %v120_v8 = vshrl.u32 %v117_v9, 16  ;;  %v123_v33 = vshll.u32 %v117_v9, 16  ;;  %v2090_v63 = vld [vmem:[%s3574_s2 + $0x4e0] sm:$0xf]  ;;  %v2116_v6 = vld [vmem:[%s3574_s2 + $0x64] sm:$0xf] }
  0x36   :  { %1241 = vmatpush.bf16.msrb.mxu2 %v1875_v21  ;;  %v47_v17 = vrot.slane %v45_v5, 1  ;;  %v55_v19 = vshrl.u32 %v52_v13, 16  ;;  %v58_v20 = vshll.u32 %v52_v13, 16  ;;  %v1588_v21 = vld [vmem:[%s3574_s2 + $0xf8] sm:$0xf0]  ;;  %v48_v27 = vrot.slane %v46_v11, 1 }
  0x37   :  { %1255 = vmatpush.bf16.msrb.mxu3 %v1939_v22  ;;  %v122_v22 = vrot.slane %v120_v8, 1  ;;  %v125_v23 = vrot.slane %v123_v33, 2  ;;  %v53_v28 = vpack.c.b16 %v51_v4, %v44_v62  ;;  %v128_v40 = vshrl.u32 %v118_v7, 16  ;;  %v1580_v30 = vld [vmem:[%s3574_s2 + $0xe8] sm:$0xf0] }
  0x38   :  { %1214 = vmatpush.bf16.msrb.mxu0 %v1739_v32  ;;  %v57_v32 = vrot.slane %v55_v19, 1  ;;  %v131_v49 = vshll.u32 %v118_v7, 16  ;;  %v1527_v59 = vor.u32 %v2118_v1, %v1524_v12  ;;  %v2978_v9 = vsel %vm152_vm0, %v47_v17, %v1460_v18  ;;  %v2018_v11 = vld [vmem:[%s3574_s2 + $0x450] sm:$0xf]  ;;  %v2243_v13 = vld [vmem:[%s3574_s2 + $0x454] sm:$0xf0] }
  0x39   :  { %1228 = vmatpush.bf16.msrb.mxu1 %v1803_v34  ;;  %v60_v34 = vrot.slane %v58_v20, 2  ;;  %v63_v55 = vshrl.u32 %v53_v28, 16  ;;  %v66_v56 = vshll.u32 %v53_v28, 16  ;;  %v130_v62 = vrot.slane %v128_v40, 1  ;;  %v2082_v38 = vld [vmem:[%s3574_s2 + $0x4d0] sm:$0xf] }
  0x3a   :  { %1242 = vmatpush.bf16.msrb.mxu2 %v1867_v35  ;;  %v1461_v35 = vrot.slane %v111_v14, 5  ;;  %v133_v5 = vrot.slane %v131_v49, 2  ;;  %v1583_v14 = vor.u32 %v2132_v29, %v1580_v30  ;;  %v2259_v7 = vld [vmem:[%s3574_s2 + $0x4d4] sm:$0xf0]  ;;  %v2130_v1 = vld [vmem:[%s3574_s2 + $0xd4] sm:$0xf]  ;;  %v2019_v33 = vor.u32 %v2243_v13, %v2018_v11 }
  0x3b   :  { %1256 = vmatpush.bf16.msrb.mxu3 %v1931_v41  ;;  %v2026_v41 = vld [vmem:[%s3574_s2 + $0x460] sm:$0xf]  ;;  %v65_v54 = vrot.slane %v63_v55, 1  ;;  %v68_v2 = vrot.slane %v66_v56, 2  ;;  %v1572_v12 = vld [vmem:[%s3574_s2 + $0xd8] sm:$0xf0] }
  0x3c   :  { %1215 = vmatpush.bf16.msrb.mxu0 %v1731_v42  ;;  %v126_v42 = vor.u32 %v125_v23, %v122_v22  ;;  %v2981_v24 = vsel %vm152_vm0, %v48_v27, %v1461_v35  ;;  %v2027_v25 = vor.u32 %v2245_v50, %v2026_v41  ;;  %v2010_v17 = vld [vmem:[%s3574_s2 + $0x440] sm:$0xf]  ;;  %v2241_v18 = vld [vmem:[%s3574_s2 + $0x444] sm:$0xf0]  ;;  %v1575_v20 = vor.u32 %v2130_v1, %v1572_v12  ;;  %v2112_v23 = vld [vmem:[%s3574_s2 + $0x44] sm:$0xf] }
  0x3d   :  { %1229 = vmatpush.bf16.msrb.mxu1 %v1795_v43  ;;  %v1591_v43 = vor.u32 %v2134_v16, %v1588_v21  ;;  %v69_v36 = vor.u32 %v68_v2, %v65_v54  ;;  %v2083_v16 = vor.u32 %v2259_v7, %v2082_v38  ;;  %v2074_v21 = vld [vmem:[%s3574_s2 + $0x4c0] sm:$0xf]  ;;  %v2257_v22 = vld [vmem:[%s3574_s2 + $0x4c4] sm:$0xf0]  ;;  %v1500_v27 = vld [vmem:[%s3574_s2 + $0x48] sm:$0xf0] }
  0x3e   :  { %1243 = vmatpush.bf16.msrb.mxu2 %v1859_v44  ;;  %v61_v44 = vor.u32 %v60_v34, %v57_v32  ;;  %v148_v53 = vrot.slane %v126_v42, 4  ;;  %v2128_v28 = vld [vmem:[%s3574_s2 + $0xc4] sm:$0xf]  ;;  %v1564_v32 = vld [vmem:[%s3574_s2 + $0xc8] sm:$0xf0]  ;;  %v2011_v34 = vor.u32 %v2241_v18, %v2010_v17  ;;  %v2075_v35 = vor.u32 %v2257_v22, %v2074_v21 }
  0x3f   :  { %1257 = vmatpush.bf16.msrb.mxu3 %v1923_v45  ;;  %v2261_v45 = vld [vmem:[%s3574_s2 + $0x4e4] sm:$0xf0]  ;;  %v2002_v40 = vld [vmem:[%s3574_s2 + $0x430] sm:$0xf]  ;;  %v2239_v41 = vld [vmem:[%s3574_s2 + $0x434] sm:$0xf0]  ;;  %v1503_v42 = vor.u32 %v2112_v23, %v1500_v27  ;;  %v1567_v55 = vor.u32 %v2128_v28, %v1564_v32 }
  0x40   :  { %1216 = vmatpush.bf16.msrb.mxu0 %v1723_v46  ;;  %v1516_v46 = vld [vmem:[%s3574_s2 + $0x68] sm:$0xf0]  ;;  %v2996_v31 = vsel %vm152_vm0, %v61_v44, %v148_v53  ;;  %v2066_v56 = vld [vmem:[%s3574_s2 + $0x4b0] sm:$0xf]  ;;  %v2255_v49 = vld [vmem:[%s3574_s2 + $0x4b4] sm:$0xf0] }
  0x41   :  { %1230 = vmatpush.bf16.msrb.mxu1 %v1787_v47  ;;  %v134_v47 = vor.u32 %v133_v5, %v130_v62  ;;  %v2110_v50 = vld [vmem:[%s3574_s2 + $0x34] sm:$0xf]  ;;  %v1556_v44 = vld [vmem:[%s3574_s2 + $0xb8] sm:$0xf0]  ;;  %v2003_v62 = vor.u32 %v2239_v41, %v2002_v40  ;;  %v2237_v53 = vld [vmem:[%s3574_s2 + $0x424] sm:$0xf0] }
  0x42   :  { %1244 = vmatpush.bf16.msrb.mxu2 %v1851_v51  ;;  %v2091_v51 = vor.u32 %v2261_v45, %v2090_v63  ;;  %v1994_v63 = vld [vmem:[%s3574_s2 + $0x420] sm:$0xf]  ;;  %v2067_v45 = vor.u32 %v2255_v49, %v2066_v56  ;;  %v2253_v2 = vld [vmem:[%s3574_s2 + $0x4a4] sm:$0xf0]  ;;  %v1459_v29 = vld [vmem:[%s3575_s1 + $0x10] sm:$0xcc] }
  0x43   :  { %1258 = vmatpush.bf16.msrb.mxu3 %v1915_v52  ;;  %1217 = vmatmul.bf16.vlgmr.msrb.gmra.mxu0 %v2978_v9  ;;  %v149_v39 = vrot.slane %v134_v47, 4  ;;  %v1519_v52 = vor.u32 %v2116_v6, %v1516_v46  ;;  %v2058_v54 = vld [vmem:[%s3574_s2 + $0x4a0] sm:$0xf]  ;;  %v1484_v30 = vld [vmem:[%s3574_s2 + $0x28] sm:$0xf0] }
  0x44   :  { %1265 = vmatpush.bf16.msra.mxu0 %v2035_v10  ;;  %v2114_v10 = vld [vmem:[%s3574_s2 + $0x54] sm:$0xf]  ;;  %1231 = vmatmul.bf16.vlgmr.msrb.gmra.mxu1 %v2981_v24  ;;  %v17_v46 = vld [vmem:[%s3575_s1] sm:$0xcc]  ;;  %v1548_v47 = vld [vmem:[%s3574_s2 + $0xa8] sm:$0xf0]  ;;  %v2059_v11 = vor.u32 %v2253_v2, %v2058_v54 }
  0x45   :  { %1279 = vmatpush.bf16.msra.mxu1 %v2099_v15  ;;  %1245 = vmatmul.bf16.vlgmr.msrb.gmra.mxu2 %v2996_v31  ;;  %v1508_v15 = vld [vmem:[%s3574_s2 + $0x58] sm:$0xf0]  ;;  %v3026_v8 = vsel %vm152_vm0, %v69_v36, %v149_v39  ;;  %v2124_v36 = vld [vmem:[%s3574_s2 + $0xa4] sm:$0xf]  ;;  %v1986_v13 = vld [vmem:[%s3574_s2 + $0x410] sm:$0xf] }
  0x46   :  { %1293 = vmatpush.bf16.msra.mxu2 %v1527_v59  ;;  %1259 = vmatmul.bf16.vlgmr.msrb.gmra.mxu3 %v3026_v8  ;;  %v1511_v19 = vor.u32 %v2114_v10, %v1508_v15  ;;  %v1492_v59 = vld [vmem:[%s3574_s2 + $0x38] sm:$0xf0]  ;;  %v2235_v38 = vld [vmem:[%s3574_s2 + $0x414] sm:$0xf0]  ;;  %v2050_v39 = vld [vmem:[%s3574_s2 + $0x490] sm:$0xf]  ;;  %v1551_v10 = vor.u32 %v2124_v36, %v1548_v47 }
  0x47   :  { %1307 = vmatpush.bf16.msra.mxu3 %v1591_v43  ;;  %v2126_v43 = vld [vmem:[%s3574_s2 + $0xb4] sm:$0xf]  ;;  %v1495_v5 = vor.u32 %v2110_v50, %v1492_v59  ;;  %v2251_v15 = vld [vmem:[%s3574_s2 + $0x494] sm:$0xf0]  ;;  %v1476_v12 = vld [vmem:[%s3574_s2 + $0x18] sm:$0xf0] }
  0x48   :  { %1266 = vmatpush.bf16.msra.mxu0 %v2027_v25  ;;  %v1559_v6 = vor.u32 %v2126_v43, %v1556_v44  ;;  %v2108_v25 = vld [vmem:[%s3574_s2 + $0x24] sm:$0xf]  ;;  %v2106_v1 = vld [vmem:[%s3574_s2 + $0x14] sm:$0xf]  ;;  %v1540_v18 = vld [vmem:[%s3574_s2 + $0x98] sm:$0xf0]  ;;  %v2051_v22 = vor.u32 %v2251_v15, %v2050_v39 }
  0x49   :  { %1280 = vmatpush.bf16.msra.mxu1 %v2091_v51  ;;  %v1995_v51 = vor.u32 %v2237_v53, %v1994_v63  ;;  %v1487_v7 = vor.u32 %v2108_v25, %v1484_v30  ;;  %v2122_v17 = vld [vmem:[%s3574_s2 + $0x94] sm:$0xf]  ;;  %v2233_v21 = vld [vmem:[%s3574_s2 + $0x404] sm:$0xf0]  ;;  %v1479_v23 = vor.u32 %v2106_v1, %v1476_v12  ;;  %v2042_v27 = vld [vmem:[%s3574_s2 + $0x480] sm:$0xf] }
  0x4a   :  { %1294 = vmatpush.bf16.msra.mxu2 %v1519_v52  ;;  %v71_v52 = vunpack.c.l.b16 %v17_v46  ;;  %v2249_v28 = vld [vmem:[%s3574_s2 + $0x484] sm:$0xf0]  ;;  %v2104_v32 = vld [vmem:[%s3574_s2 + $0x4] sm:$0xf]  ;;  %v1543_v40 = vor.u32 %v2122_v17, %v1540_v18  ;;  %v1468_v41 = vld [vmem:[%s3574_s2 + $0x8] sm:$0xf0] }
  0x4b   :  { %1308 = vmatpush.bf16.msra.mxu3 %v1583_v14  ;;  %v136_v14 = vunpack.c.l.b16 %v1459_v29  ;;  %v2120_v56 = vld [vmem:[%s3574_s2 + $0x84] sm:$0xf]  ;;  %v1532_v49 = vld [vmem:[%s3574_s2 + $0x88] sm:$0xf0]  ;;  %v2166_v50 = vld [vmem:[%s3574_s2 + $0x1f4] sm:$0xf]  ;;  %v1471_v53 = vor.u32 %v2104_v32, %v1468_v41 }
  0x4c   :  { %1267 = vmatpush.bf16.msra.mxu0 %v2019_v33  ;;  %v72_v33 = vunpack.c.h.b16 %v17_v46  ;;  %v1716_v61 = vld [vmem:[%s3574_s2 + $0x1f8] sm:$0xf0]  ;;  %v2182_v57 = vld [vmem:[%s3574_s2 + $0x274] sm:$0xf]  ;;  %v1535_v54 = vor.u32 %v2120_v56, %v1532_v49  ;;  %v1644_v25 = vld [vmem:[%s3574_s2 + $0x168] sm:$0xf0] }
  0x4d   :  { %1281 = vmatpush.bf16.msra.mxu1 %v2083_v16  ;;  %v137_v16 = vunpack.c.h.b16 %v1459_v29  ;;  %v2198_v44 = vld [vmem:[%s3574_s2 + $0x2f4] sm:$0xf]  ;;  %v1719_v46 = vor.u32 %v2166_v50, %v1716_v61  ;;  %v2164_v30 = vld [vmem:[%s3574_s2 + $0x1e4] sm:$0xf]  ;;  %v1708_v47 = vld [vmem:[%s3574_s2 + $0x1e8] sm:$0xf0] }
  0x4e   :  { %1295 = vmatpush.bf16.msra.mxu2 %v1511_v19  ;;  %v1987_v19 = vor.u32 %v2235_v38, %v1986_v13  ;;  %v2196_v39 = vld [vmem:[%s3574_s2 + $0x2e4] sm:$0xf]  ;;  %v1711_v15 = vor.u32 %v2164_v30, %v1708_v47  ;;  %v2162_v12 = vld [vmem:[%s3574_s2 + $0x1d4] sm:$0xf]  ;;  %v1764_v18 = vld [vmem:[%s3574_s2 + $0x258] sm:$0xf0] }
  0x4f   :  { %1309 = vmatpush.bf16.msra.mxu3 %v1575_v20  ;;  %v1978_v20 = vld [vmem:[%s3574_s2 + $0x400] sm:$0xf]  ;;  %v2178_v17 = vld [vmem:[%s3574_s2 + $0x254] sm:$0xf]  ;;  %v2160_v32 = vld [vmem:[%s3574_s2 + $0x1c4] sm:$0xf] }
  0x50   :  { %1268 = vmatpush.bf16.msra.mxu0 %v2011_v34  ;;  %v73_v34 = vpack.c.b16 %v50_v0, %v71_v52  ;;  %v74_v0 = vpack.c.b16 %v51_v4, %v72_v33  ;;  %v1979_v59 = vor.u32 %v2233_v21, %v1978_v20  ;;  %v2043_v4 = vor.u32 %v2249_v28, %v2042_v27  ;;  %v1836_v52 = vld [vmem:[%s3574_s2 + $0x2e8] sm:$0xf0]  ;;  %v2194_v20 = vld [vmem:[%s3574_s2 + $0x2d4] sm:$0xf]  ;;  %v1828_v21 = vld [vmem:[%s3574_s2 + $0x2d8] sm:$0xf0] }
  0x51   :  { %1282 = vmatpush.bf16.msra.mxu1 %v2075_v35  ;;  %v138_v35 = vpack.c.b16 %v115_v60, %v136_v14  ;;  %v139_v60 = vpack.c.b16 %v116_v3, %v137_v16  ;;  %v1780_v3 = vld [vmem:[%s3574_s2 + $0x278] sm:$0xf0]  ;;  %v1839_v33 = vor.u32 %v2196_v39, %v1836_v52  ;;  %v1767_v28 = vor.u32 %v2178_v17, %v1764_v18  ;;  %v2192_v41 = vld [vmem:[%s3574_s2 + $0x2c4] sm:$0xf]  ;;  %v2158_v49 = vld [vmem:[%s3574_s2 + $0x1b4] sm:$0xf] }
  0x52   :  { %1296 = vmatpush.bf16.msra.mxu2 %v1503_v42  ;;  %v2150_v42 = vld [vmem:[%s3574_s2 + $0x174] sm:$0xf]  ;;  %v75_v63 = vrot.slane %v73_v34, 2  ;;  %v76_v2 = vrot.slane %v74_v0, 2  ;;  %v1783_v29 = vor.u32 %v2182_v57, %v1780_v3  ;;  %v1700_v16 = vld [vmem:[%s3574_s2 + $0x1d8] sm:$0xf0]  ;;  %v1831_v34 = vor.u32 %v2194_v20, %v1828_v21 }
  0x53   :  { %1310 = vmatpush.bf16.msra.mxu3 %v1567_v55  ;;  %v1652_v55 = vld [vmem:[%s3574_s2 + $0x178] sm:$0xf0]  ;;  %v1703_v27 = vor.u32 %v2162_v12, %v1700_v16  ;;  %v2174_v61 = vld [vmem:[%s3574_s2 + $0x234] sm:$0xf]  ;;  %v2136_v12 = vld [vmem:[%s3574_s2 + $0x104] sm:$0xf] }
  0x54   :  { %1269 = vmatpush.bf16.msra.mxu0 %v2003_v62  ;;  %v1655_v43 = vor.u32 %v2150_v42, %v1652_v55  ;;  %v1844_v62 = vld [vmem:[%s3574_s2 + $0x2f8] sm:$0xf0]  ;;  %v1820_v42 = vld [vmem:[%s3574_s2 + $0x2c8] sm:$0xf0]  ;;  %v2142_v55 = vld [vmem:[%s3574_s2 + $0x134] sm:$0xf] }
  0x55   :  { %1283 = vmatpush.bf16.msra.mxu1 %v2067_v45  ;;  %v1462_v45 = vrot.slane %v138_v35, 6  ;;  %v1847_v36 = vor.u32 %v2198_v44, %v1844_v62  ;;  %v1692_v35 = vld [vmem:[%s3574_s2 + $0x1c8] sm:$0xf0]  ;;  %v1620_v0 = vld [vmem:[%s3574_s2 + $0x138] sm:$0xf0]  ;;  %v1823_v50 = vor.u32 %v2192_v41, %v1820_v42 }
  0x56   :  { %1297 = vmatpush.bf16.msra.mxu2 %v1495_v5  ;;  %v1463_v5 = vrot.slane %v139_v60, 6  ;;  %v1695_v60 = vor.u32 %v2160_v32, %v1692_v35  ;;  %v1748_v57 = vld [vmem:[%s3574_s2 + $0x238] sm:$0xf0]  ;;  %v1623_v3 = vor.u32 %v2142_v55, %v1620_v0  ;;  %v2140_v44 = vld [vmem:[%s3574_s2 + $0x124] sm:$0xf] }
  0x57   :  { %1311 = vmatpush.bf16.msra.mxu3 %v1559_v6  ;;  %v2148_v6 = vld [vmem:[%s3574_s2 + $0x164] sm:$0xf]  ;;  %v3206_v13 = vsel %vm152_vm0, %v75_v63, %v1462_v45  ;;  %v1612_v62 = vld [vmem:[%s3574_s2 + $0x128] sm:$0xf0]  ;;  %v1751_v45 = vor.u32 %v2174_v61, %v1748_v57  ;;  %v2138_v30 = vld [vmem:[%s3574_s2 + $0x114] sm:$0xf] }
  0x58   :  { %1270 = vmatpush.bf16.msra.mxu0 %v1995_v51  ;;  %v2180_v51 = vld [vmem:[%s3574_s2 + $0x264] sm:$0xf]  ;;  %v1647_v38 = vor.u32 %v2148_v6, %v1644_v25  ;;  %v3215_v14 = vsel %vm152_vm0, %v76_v2, %v1463_v5  ;;  %v1676_v2 = vld [vmem:[%s3574_s2 + $0x1a8] sm:$0xf0]  ;;  %v1615_v25 = vor.u32 %v2140_v44, %v1612_v62  ;;  %v1668_v39 = vld [vmem:[%s3574_s2 + $0x198] sm:$0xf0] }
  0x59   :  { %1284 = vmatpush.bf16.msra.mxu1 %v2059_v11  ;;  %v1772_v11 = vld [vmem:[%s3574_s2 + $0x268] sm:$0xf0]  ;;  %v2172_v5 = vld [vmem:[%s3574_s2 + $0x224] sm:$0xf]  ;;  %v2170_v52 = vld [vmem:[%s3574_s2 + $0x214] sm:$0xf] }
  0x5a   :  { %1298 = vmatpush.bf16.msra.mxu2 %v1487_v7  ;;  %v2146_v7 = vld [vmem:[%s3574_s2 + $0x154] sm:$0xf]  ;;  %v1775_v1 = vor.u32 %v2180_v51, %v1772_v11  ;;  %v1740_v6 = vld [vmem:[%s3574_s2 + $0x228] sm:$0xf0]  ;;  %v2152_v16 = vld [vmem:[%s3574_s2 + $0x184] sm:$0xf] }
  0x5b   :  { %1312 = vmatpush.bf16.msra.mxu3 %v1551_v10  ;;  %v1636_v10 = vld [vmem:[%s3574_s2 + $0x158] sm:$0xf0]  ;;  %v1743_v51 = vor.u32 %v2172_v5, %v1740_v6  ;;  %v2154_v11 = vld [vmem:[%s3574_s2 + $0x194] sm:$0xf]  ;;  %v1660_v17 = vld [vmem:[%s3574_s2 + $0x188] sm:$0xf0] }
  0x5c   :  { %1271 = vmatpush.bf16.msra.mxu0 %v1987_v19  ;;  %v1639_v19 = vor.u32 %v2146_v7, %v1636_v10  ;;  %v1732_v7 = vld [vmem:[%s3574_s2 + $0x218] sm:$0xf0]  ;;  %v1671_v18 = vor.u32 %v2154_v11, %v1668_v39  ;;  %v2168_v20 = vld [vmem:[%s3574_s2 + $0x204] sm:$0xf]  ;;  %v2214_v21 = vld [vmem:[%s3574_s2 + $0x374] sm:$0xf]  ;;  %v1663_v0 = vor.u32 %v2152_v16, %v1660_v17 }
  0x5d   :  { %1285 = vmatpush.bf16.msra.mxu1 %v2051_v22  ;;  %v2144_v22 = vld [vmem:[%s3574_s2 + $0x144] sm:$0xf]  ;;  %v1788_v32 = vld [vmem:[%s3574_s2 + $0x288] sm:$0xf0]  ;;  %v2230_v35 = vld [vmem:[%s3574_s2 + $0x3f4] sm:$0xf] }
  0x5e   :  { %1299 = vmatpush.bf16.msra.mxu2 %v1479_v23  ;;  %v1628_v23 = vld [vmem:[%s3574_s2 + $0x148] sm:$0xf0]  ;;  %v2036_v41 = vld [vmem:[%s3574_s2 + $0x478] sm:$0xf0]  ;;  %v2262_v42 = vld [vmem:[%s3574_s2 + $0x4f4] sm:$0xf] }
  0x5f   :  { %1313 = vmatpush.bf16.msra.mxu3 %v1543_v40  ;;  %v1631_v40 = vor.u32 %v2144_v22, %v1628_v23  ;;  %v1908_v22 = vld [vmem:[%s3574_s2 + $0x378] sm:$0xf0]  ;;  %v2028_v44 = vld [vmem:[%s3574_s2 + $0x468] sm:$0xf0]  ;;  %v2260_v62 = vld [vmem:[%s3574_s2 + $0x4e4] sm:$0xf] }
  0x60   :  { %1272 = vmatpush.bf16.msra.mxu0 %v1979_v59  ;;  %v1684_v59 = vld [vmem:[%s3574_s2 + $0x1b8] sm:$0xf0]  ;;  %v1884_v11 = vld [vmem:[%s3574_s2 + $0x348] sm:$0xf0] }
  0x61   :  { %1286 = vmatpush.bf16.msra.mxu1 %v2043_v4  ;;  %v2190_v4 = vld [vmem:[%s3574_s2 + $0x2b4] sm:$0xf]  ;;  %v1687_v63 = vor.u32 %v2158_v49, %v1684_v59  ;;  %v2100_v55 = vld [vmem:[%s3574_s2 + $0x4f8] sm:$0xf0]  ;;  %v1900_v59 = vld [vmem:[%s3574_s2 + $0x368] sm:$0xf0] }
  0x62   :  { %1300 = vmatpush.bf16.msra.mxu2 %v1471_v53  ;;  %v2156_v53 = vld [vmem:[%s3574_s2 + $0x1a4] sm:$0xf]  ;;  %v2103_v57 = vor.u32 %v2262_v42, %v2100_v55  ;;  %v1876_v16 = vld [vmem:[%s3574_s2 + $0x338] sm:$0xf0]  ;;  %v1996_v55 = vld [vmem:[%s3574_s2 + $0x428] sm:$0xf0] }
  0x63   :  { %1314 = vmatpush.bf16.msra.mxu3 %v1535_v54  ;;  %1273 = vmatmul.bf16.vlgmr.msra.gmra.mxu0 %v3206_v13  ;;  %v1679_v47 = vor.u32 %v2156_v53, %v1676_v2  ;;  %v1892_v2 = vld [vmem:[%s3574_s2 + $0x358] sm:$0xf0]  ;;  %v2236_v42 = vld [vmem:[%s3574_s2 + $0x424] sm:$0xf] }
  0x64   :  { %1321 = vmatpush.bf16.msrb.mxu0 %v1655_v43  ;;  %1287 = vmatmul.bf16.vlgmr.msra.gmra.mxu1 %v3215_v14  ;;  %v1812_v43 = vld [vmem:[%s3574_s2 + $0x2b8] sm:$0xf0] }
  0x65   :  { %1335 = vmatpush.bf16.msrb.mxu1 %v1719_v46  ;;  %1301 = vmatmul.bf16.vlgmr.msra.gmra.mxu2 %v2658_v37  ;;  %v2176_v37 = vld [vmem:[%s3574_s2 + $0x244] sm:$0xf]  ;;  %v1815_v54 = vor.u32 %v2190_v4, %v1812_v43  ;;  %v1964_v4 = vld [vmem:[%s3574_s2 + $0x3e8] sm:$0xf0] }
  0x66   :  { %1349 = vmatpush.bf16.msrb.mxu2 %v1783_v29  ;;  %1315 = vmatmul.bf16.vlgmr.msra.gmra.mxu3 %v2712_v58  ;;  %v1756_v58 = vld [vmem:[%s3574_s2 + $0x248] sm:$0xf0]  ;;  %v2188_v46 = vld [vmem:[%s3574_s2 + $0x2a4] sm:$0xf] }
  0x67   :  { %1363 = vmatpush.bf16.msrb.mxu3 %v1847_v36  ;;  %v1759_v56 = vor.u32 %v2176_v37, %v1756_v58  ;;  %v1804_v29 = vld [vmem:[%s3574_s2 + $0x2a8] sm:$0xf0]  ;;  %v1604_v36 = vld [vmem:[%s3574_s2 + $0x118] sm:$0xf0]  ;;  %v2246_v58 = vld [vmem:[%s3574_s2 + $0x474] sm:$0xf] }
  0x68   :  { %1322 = vmatpush.bf16.msrb.mxu0 %v1647_v38  ;;  %v1807_v38 = vor.u32 %v2188_v46, %v1804_v29  ;;  %v1607_v10 = vor.u32 %v2138_v30, %v1604_v36  ;;  %v1972_v37 = vld [vmem:[%s3574_s2 + $0x3f8] sm:$0xf0]  ;;  %v2039_v61 = vor.u32 %v2246_v58, %v2036_v41  ;;  %v2244_v43 = vld [vmem:[%s3574_s2 + $0x464] sm:$0xf]  ;;  %v2242_v29 = vld [vmem:[%s3574_s2 + $0x454] sm:$0xf] }
  0x69   :  { %1336 = vmatpush.bf16.msrb.mxu1 %v1711_v15  ;;  %v2186_v15 = vld [vmem:[%s3574_s2 + $0x294] sm:$0xf]  ;;  %v1975_v49 = vor.u32 %v2230_v35, %v1972_v37  ;;  %v2031_v5 = vor.u32 %v2244_v43, %v2028_v44  ;;  %v1956_v46 = vld [vmem:[%s3574_s2 + $0x3d8] sm:$0xf0]  ;;  %v1868_v35 = vld [vmem:[%s3574_s2 + $0x328] sm:$0xf0] }
  0x6a   :  { %1350 = vmatpush.bf16.msrb.mxu2 %v1775_v1  ;;  %v1796_v1 = vld [vmem:[%s3574_s2 + $0x298] sm:$0xf0]  ;;  %v2258_v36 = vld [vmem:[%s3574_s2 + $0x4d4] sm:$0xf]  ;;  %v1932_v41 = vld [vmem:[%s3574_s2 + $0x3a8] sm:$0xf0] }
  0x6b   :  { %1364 = vmatpush.bf16.msrb.mxu3 %v1839_v33  ;;  %v1596_v33 = vld [vmem:[%s3574_s2 + $0x108] sm:$0xf0]  ;;  %v1799_v23 = vor.u32 %v2186_v15, %v1796_v1  ;;  %v2020_v30 = vld [vmem:[%s3574_s2 + $0x458] sm:$0xf0]  ;;  %v2234_v43 = vld [vmem:[%s3574_s2 + $0x414] sm:$0xf] }
  0x6c   :  { %1323 = vmatpush.bf16.msrb.mxu0 %v1639_v19  ;;  %v1735_v19 = vor.u32 %v2170_v52, %v1732_v7  ;;  %v2240_v52 = vld [vmem:[%s3574_s2 + $0x444] sm:$0xf]  ;;  %v2012_v7 = vld [vmem:[%s3574_s2 + $0x448] sm:$0xf0]  ;;  %v1988_v44 = vld [vmem:[%s3574_s2 + $0x418] sm:$0xf0] }
  0x6d   :  { %1337 = vmatpush.bf16.msrb.mxu1 %v1703_v27  ;;  %v1724_v27 = vld [vmem:[%s3574_s2 + $0x208] sm:$0xf0]  ;;  %v2015_v17 = vor.u32 %v2240_v52, %v2012_v7 }
  0x6e   :  { %1351 = vmatpush.bf16.msrb.mxu2 %v1767_v28  ;;  %v2184_v28 = vld [vmem:[%s3574_s2 + $0x284] sm:$0xf]  ;;  %v2076_v15 = vld [vmem:[%s3574_s2 + $0x4c8] sm:$0xf0] }
  0x6f   :  { %1365 = vmatpush.bf16.msrb.mxu3 %v1831_v34  ;;  %v1599_v34 = vor.u32 %v2136_v12, %v1596_v33  ;;  %v2206_v33 = vld [vmem:[%s3574_s2 + $0x334] sm:$0xf] }
  0x70   :  { %1324 = vmatpush.bf16.msrb.mxu0 %v1631_v40  ;;  %v1911_v40 = vor.u32 %v2214_v21, %v1908_v22  ;;  %v2238_v21 = vld [vmem:[%s3574_s2 + $0x434] sm:$0xf]  ;;  %v2004_v22 = vld [vmem:[%s3574_s2 + $0x438] sm:$0xf0] }
  0x71   :  { %1338 = vmatpush.bf16.msrb.mxu1 %v1695_v60  ;;  %v1727_v60 = vor.u32 %v2168_v20, %v1724_v27  ;;  %v1940_v20 = vld [vmem:[%s3574_s2 + $0x3b8] sm:$0xf0]  ;;  %v2007_v37 = vor.u32 %v2238_v21, %v2004_v22 }
  0x72   :  { %1352 = vmatpush.bf16.msrb.mxu2 %v1759_v56  ;;  %v1791_v56 = vor.u32 %v2184_v28, %v1788_v32  ;;  %v2068_v27 = vld [vmem:[%s3574_s2 + $0x4b8] sm:$0xf0]  ;;  %v1879_v28 = vor.u32 %v2206_v33, %v1876_v16 }
  0x73   :  { %1366 = vmatpush.bf16.msrb.mxu3 %v1823_v50  ;;  %v2212_v50 = vld [vmem:[%s3574_s2 + $0x364] sm:$0xf] }
  0x74   :  { %1325 = vmatpush.bf16.msrb.mxu0 %v1623_v3  ;;  %v2228_v3 = vld [vmem:[%s3574_s2 + $0x3e4] sm:$0xf] }
  0x75   :  { %1339 = vmatpush.bf16.msrb.mxu1 %v1687_v63  ;;  %v2092_v63 = vld [vmem:[%s3574_s2 + $0x4e8] sm:$0xf0]  ;;  %v1967_v53 = vor.u32 %v2228_v3, %v1964_v4  ;;  %v2218_v3 = vld [vmem:[%s3574_s2 + $0x394] sm:$0xf]  ;;  %v1924_v4 = vld [vmem:[%s3574_s2 + $0x398] sm:$0xf0] }
  0x76   :  { %1353 = vmatpush.bf16.msrb.mxu2 %v1751_v45  ;;  %v1903_v45 = vor.u32 %v2212_v50, %v1900_v59  ;;  %v2095_v6 = vor.u32 %v2260_v62, %v2092_v63  ;;  %v2202_v50 = vld [vmem:[%s3574_s2 + $0x314] sm:$0xf]  ;;  %v1860_v59 = vld [vmem:[%s3574_s2 + $0x318] sm:$0xf0] }
  0x77   :  { %1367 = vmatpush.bf16.msrb.mxu3 %v1815_v54  ;;  %v2210_v54 = vld [vmem:[%s3574_s2 + $0x354] sm:$0xf]  ;;  %v2052_v63 = vld [vmem:[%s3574_s2 + $0x498] sm:$0xf0] }
  0x78   :  { %1326 = vmatpush.bf16.msrb.mxu0 %v1615_v25  ;;  %v2226_v25 = vld [vmem:[%s3574_s2 + $0x3d4] sm:$0xf] }
  0x79   :  { %1340 = vmatpush.bf16.msrb.mxu1 %v1679_v47  ;;  %v2084_v47 = vld [vmem:[%s3574_s2 + $0x4d8] sm:$0xf0]  ;;  %v2250_v62 = vld [vmem:[%s3574_s2 + $0x494] sm:$0xf] }
  0x7a   :  { %1354 = vmatpush.bf16.msrb.mxu2 %v1743_v51  ;;  %v2208_v51 = vld [vmem:[%s3574_s2 + $0x344] sm:$0xf]  ;;  %v2087_v39 = vor.u32 %v2258_v36, %v2084_v47  ;;  %v2044_v47 = vld [vmem:[%s3574_s2 + $0x488] sm:$0xf0] }
  0x7b   :  { %1368 = vmatpush.bf16.msrb.mxu3 %v1807_v38  ;;  %v2023_v38 = vor.u32 %v2242_v29, %v2020_v30  ;;  %v1887_v1 = vor.u32 %v2208_v51, %v1884_v11  ;;  %v2232_v29 = vld [vmem:[%s3574_s2 + $0x404] sm:$0xf]  ;;  %v1980_v30 = vld [vmem:[%s3574_s2 + $0x408] sm:$0xf0] }
  0x7c   :  { %1327 = vmatpush.bf16.msrb.mxu0 %v1607_v10  ;;  %v2256_v10 = vld [vmem:[%s3574_s2 + $0x4c4] sm:$0xf]  ;;  %v1983_v51 = vor.u32 %v2232_v29, %v1980_v30 }
  0x7d   :  { %1341 = vmatpush.bf16.msrb.mxu1 %v1671_v18  ;;  %v2079_v18 = vor.u32 %v2256_v10, %v2076_v15  ;;  %v2248_v36 = vld [vmem:[%s3574_s2 + $0x484] sm:$0xf] }
  0x7e   :  { %1355 = vmatpush.bf16.msrb.mxu2 %v1735_v19  ;;  %v2222_v19 = vld [vmem:[%s3574_s2 + $0x3b4] sm:$0xf]  ;;  %v2047_v11 = vor.u32 %v2248_v36, %v2044_v47 }
  0x7f   :  { %1369 = vmatpush.bf16.msrb.mxu3 %v1799_v23  ;;  %v2254_v23 = vld [vmem:[%s3574_s2 + $0x4b4] sm:$0xf]  ;;  %v1943_v32 = vor.u32 %v2222_v19, %v1940_v20 }
  0x80   :  { %1328 = vmatpush.bf16.msrb.mxu0 %v1599_v34  ;;  %v2204_v34 = vld [vmem:[%s3574_s2 + $0x324] sm:$0xf]  ;;  %v2071_v58 = vor.u32 %v2254_v23, %v2068_v27 }
  0x81   :  { %1342 = vmatpush.bf16.msrb.mxu1 %v1663_v0  ;;  %v2252_v0 = vld [vmem:[%s3574_s2 + $0x4a4] sm:$0xf] }
  0x82   :  { %1356 = vmatpush.bf16.msrb.mxu2 %v1727_v60  ;;  %v2060_v60 = vld [vmem:[%s3574_s2 + $0x4a8] sm:$0xf0] }
  0x83   :  { %1370 = vmatpush.bf16.msrb.mxu3 %v1791_v56  ;;  %1329 = vmatmul.bf16.vlgmr.msrb.gmra.mxu0 %v2820_v26  ;;  %v1895_v26 = vor.u32 %v2210_v54, %v1892_v2  ;;  %v1871_v56 = vor.u32 %v2204_v34, %v1868_v35  ;;  %v2200_v54 = vld [vmem:[%s3574_s2 + $0x304] sm:$0xf]  ;;  %v1852_v2 = vld [vmem:[%s3574_s2 + $0x308] sm:$0xf0] }
  0x84   :  { %1377 = vmatpush.bf16.msra.mxu0 %v1911_v40  ;;  %1343 = vmatmul.bf16.vlgmr.msrb.gmra.mxu1 %v2874_v48  ;;  %v2224_v48 = vld [vmem:[%s3574_s2 + $0x3c4] sm:$0xf] }
  0x85   :  { %1391 = vmatpush.bf16.msra.mxu1 %v1975_v49  ;;  %1357 = vmatmul.bf16.vlgmr.msrb.gmra.mxu2 %v2978_v9  ;;  %v1959_v9 = vor.u32 %v2226_v25, %v1956_v46  ;;  %v2220_v40 = vld [vmem:[%s3574_s2 + $0x3a4] sm:$0xf]  ;;  %v1916_v46 = vld [vmem:[%s3574_s2 + $0x388] sm:$0xf0] }
  0x86   :  { %1405 = vmatpush.bf16.msra.mxu2 %v2039_v61  ;;  %1371 = vmatmul.bf16.vlgmr.msrb.gmra.mxu3 %v2981_v24  ;;  %v1948_v24 = vld [vmem:[%s3574_s2 + $0x3c8] sm:$0xf0]  ;;  %v1935_v49 = vor.u32 %v2220_v40, %v1932_v41  ;;  %v1999_v61 = vor.u32 %v2236_v42, %v1996_v55  ;;  %v2216_v25 = vld [vmem:[%s3574_s2 + $0x384] sm:$0xf] }
  0x87   :  { %1419 = vmatpush.bf16.msra.mxu3 %v2103_v57  ;;  %v1951_v12 = vor.u32 %v2224_v48, %v1948_v24  ;;  %v2063_v57 = vor.u32 %v2252_v0, %v2060_v60 }
  0x88   :  { %1378 = vmatpush.bf16.msra.mxu0 %v1903_v45  ;;  %v1863_v45 = vor.u32 %v2202_v50, %v1860_v59 }
  0x89   :  { %1392 = vmatpush.bf16.msra.mxu1 %v1967_v53  ;;  %v1927_v53 = vor.u32 %v2218_v3, %v1924_v4 }
  0x8a   :  { %1406 = vmatpush.bf16.msra.mxu2 %v2031_v5  ;;  %v1991_v5 = vor.u32 %v2234_v43, %v1988_v44 }
  0x8b   :  { %1420 = vmatpush.bf16.msra.mxu3 %v2095_v6  ;;  %v2055_v6 = vor.u32 %v2250_v62, %v2052_v63 }
  0x8c   :  { %1379 = vmatpush.bf16.msra.mxu0 %v1895_v26  ;;  %v1855_v26 = vor.u32 %v2200_v54, %v1852_v2 }
  0x8d   :  { %1393 = vmatpush.bf16.msra.mxu1 %v1959_v9  ;;  %v1919_v9 = vor.u32 %v2216_v25, %v1916_v46 }
  0x8e   :  { %1407 = vmatpush.bf16.msra.mxu2 %v2023_v38 }
  0x8f   :  { %1421 = vmatpush.bf16.msra.mxu3 %v2087_v39 }
  0x90   :  { %1380 = vmatpush.bf16.msra.mxu0 %v1887_v1 }
  0x91   :  { %1394 = vmatpush.bf16.msra.mxu1 %v1951_v12 }
  0x92   :  { %1408 = vmatpush.bf16.msra.mxu2 %v2015_v17 }
  0x93   :  { %1422 = vmatpush.bf16.msra.mxu3 %v2079_v18 }
  0x94   :  { %1381 = vmatpush.bf16.msra.mxu0 %v1879_v28 }
  0x95   :  { %1395 = vmatpush.bf16.msra.mxu1 %v1943_v32 }
  0x96   :  { %1409 = vmatpush.bf16.msra.mxu2 %v2007_v37 }
  0x97   :  { %1423 = vmatpush.bf16.msra.mxu3 %v2071_v58 }
  0x98   :  { %1382 = vmatpush.bf16.msra.mxu0 %v1871_v56 }
  0x99   :  { %1396 = vmatpush.bf16.msra.mxu1 %v1935_v49 }
  0x9a   :  { %1410 = vmatpush.bf16.msra.mxu2 %v1999_v61 }
  0x9b   :  { %1424 = vmatpush.bf16.msra.mxu3 %v2063_v57 }
  0x9c   :  { %1383 = vmatpush.bf16.msra.mxu0 %v1863_v45 }
  0x9d   :  { %1397 = vmatpush.bf16.msra.mxu1 %v1927_v53 }
  0x9e   :  { %1411 = vmatpush.bf16.msra.mxu2 %v1991_v5 }
  0x9f   :  { %1425 = vmatpush.bf16.msra.mxu3 %v2055_v6 }
  0xa0   :  { %1384 = vmatpush.bf16.msra.mxu0 %v1855_v26  ;;  %v1438_v26 = vstv %s3576_s0 }
  0xa1   :  { %1398 = vmatpush.bf16.msra.mxu1 %v1919_v9 }
  0xa2   :  { %1412 = vmatpush.bf16.msra.mxu2 %v1983_v51 }
  0xa3   :  { %1426 = vmatpush.bf16.msra.mxu3 %v2047_v11  ;;  %1385 = vmatmul.bf16.vlgmr.msra.gmra.mxu0 %v2996_v31  ;;  %v1162_v38 = vpop.f32.mrf.mxu0 }
  0xa4   :  { %1399 = vmatmul.bf16.vlgmr.msra.gmra.mxu1 %v3026_v8  ;;  %v1176_v39 = vpop.f32.mrf.mxu1 }
  0xa5   :  { %1413 = vmatmul.bf16.vlgmr.msra.gmra.mxu2 %v3206_v13  ;;  %v1177_v22 = vadd.f32 %v1176_v39, %v1162_v38 }
  0xa6   :  { %1427 = vmatmul.bf16.vlgmr.msra.gmra.mxu3 %v3215_v14 }
  0xab   :  { %v1164_v52 = vpop.f32.mrf.mxu0 }
  0xac   :  { %v1178_v7 = vpop.f32.mrf.mxu1 }
  0xad   :  { %v1179_v40 = vadd.f32 %v1178_v7, %v1164_v52 }
  0xb0   :  { %v1190_v48 = vpop.f32.mrf.mxu2 }
  0xb1   :  { %v1191_v32 = vadd.f32 %v1190_v48, %v1177_v22 }
  0xb7   :  { %v1204_v24 = vpop.f32.mrf.mxu3 }
  0xb8   :  { %v1192_v10 = vpop.f32.mrf.mxu2  ;;  %v1205_v35 = vadd.f32 %v1204_v24, %v1191_v32 }
  0xb9   :  { %v1193_v60 = vadd.f32 %v1192_v10, %v1179_v40 }
  0xbf   :  { %v1206_v15 = vpop.f32.mrf.mxu3 }
  0xc0   :  { %v1218_v1 = vpop.f32.mrf.mxu0  ;;  %v1207_v61 = vadd.f32 %v1206_v15, %v1193_v60 }
  0xc1   :  { %v1232_v12 = vpop.f32.mrf.mxu1  ;;  %v1219_v41 = vadd.f32 %v1218_v1, %v1205_v35 }
  0xc3   :  { %v1233_v56 = vadd.f32 %v1232_v12, %v1219_v41 }
  0xc8   :  { %v1246_v33 = vpop.f32.mrf.mxu2  ;;  %v1220_v17 = vpop.f32.mrf.mxu0 }
  0xc9   :  { %v1260_v16 = vpop.f32.mrf.mxu3  ;;  %v1234_v31 = vpop.f32.mrf.mxu1  ;;  %v1247_v57 = vadd.f32 %v1246_v33, %v1233_v56  ;;  %v1221_v43 = vadd.f32 %v1220_v17, %v1207_v61 }
  0xcb   :  { %v1261_v45 = vadd.f32 %v1260_v16, %v1247_v57  ;;  %v1235_v2 = vadd.f32 %v1234_v31, %v1221_v43 }
  0xd0   :  { %v1248_v18 = vpop.f32.mrf.mxu2 }
  0xd1   :  { %v1262_v8 = vpop.f32.mrf.mxu3  ;;  %v1249_v29 = vadd.f32 %v1248_v18, %v1235_v2 }
  0xd3   :  { %v1263_v11 = vadd.f32 %v1262_v8, %v1249_v29 }
  0xe0   :  { %v1274_v19 = vpop.f32.mrf.mxu0 }
  0xe1   :  { %v1288_v13 = vpop.f32.mrf.mxu1  ;;  %v1275_v5 = vadd.f32 %v1274_v19, %v1261_v45 }
  0xe3   :  { %v1289_v36 = vadd.f32 %v1288_v13, %v1275_v5 }
  0xe5   :  { %v1439_v24 = vmul.f32 %v1438_v26, %v1289_v36  ;;  %vm1434_vm1 = vcmp.ge.f32.partialorder %v1289_v36, 0.0 }
  0xe7   :  { %v1443_v12 = vsel %vm1434_vm1, %v1289_v36, %v1439_v24 }
  0xe8   :  { %v1302_v20 = vpop.f32.mrf.mxu2  ;;  %v1276_v21 = vpop.f32.mrf.mxu0 }
  0xe9   :  { %v1316_v14 = vpop.f32.mrf.mxu3  ;;  %v1290_v23 = vpop.f32.mrf.mxu1  ;;  %v1277_v52 = vadd.f32 %v1276_v21, %v1263_v11 }
  0xea   :  { %v1317_v37 = vadd.f32 %v1316_v14, %v1302_v20 }
  0xeb   :  { %v1291_v33 = vadd.f32 %v1290_v23, %v1277_v52 }
  0xed   :  { %v1441_v13 = vmul.f32 %v1438_v26, %v1291_v33  ;;  %vm1436_vm3 = vcmp.ge.f32.partialorder %v1291_v33, 0.0 }
  0xef   :  { %v1445_v21 = vsel %vm1436_vm3, %v1291_v33, %v1441_v13 }
  0xf0   :  { %v1304_v27 = vpop.f32.mrf.mxu2 }
  0xf1   :  { %v1318_v28 = vpop.f32.mrf.mxu3 }
  0xf2   :  { %v1319_v3 = vadd.f32 %v1318_v28, %v1304_v27 }
 0x100   :  { %v1330_v34 = vpop.f32.mrf.mxu0 }
 0x101   :  { %v1344_v58 = vpop.f32.mrf.mxu1  ;;  %v1331_v42 = vadd.f32 %v1330_v34, %v1317_v37 }
 0x103   :  { %v1345_v49 = vadd.f32 %v1344_v58, %v1331_v42 }
 0x108   :  { %v1358_v55 = vpop.f32.mrf.mxu2  ;;  %v1332_v50 = vpop.f32.mrf.mxu0 }
 0x109   :  { %v1372_v0 = vpop.f32.mrf.mxu3  ;;  %v1346_v59 = vpop.f32.mrf.mxu1  ;;  %v1359_v4 = vadd.f32 %v1358_v55, %v1345_v49  ;;  %v1333_v44 = vadd.f32 %v1332_v50, %v1319_v3 }
 0x10b   :  { %v1373_v53 = vadd.f32 %v1372_v0, %v1359_v4  ;;  %v1347_v6 = vadd.f32 %v1346_v59, %v1333_v44 }
 0x110   :  { %v1360_v62 = vpop.f32.mrf.mxu2 }
 0x111   :  { %v1374_v63 = vpop.f32.mrf.mxu3  ;;  %v1361_v30 = vadd.f32 %v1360_v62, %v1347_v6 }
 0x113   :  { %v1375_v38 = vadd.f32 %v1374_v63, %v1361_v30 }
 0x120   :  { %v1386_v54 = vpop.f32.mrf.mxu0 }
 0x121   :  { %v1387_v25 = vadd.f32 %v1386_v54, %v1373_v53  ;;  %v1400_v46 = vpop.f32.mrf.mxu1 }
 0x123   :  { %v1401_v47 = vadd.f32 %v1400_v46, %v1387_v25 }
 0x128   :  { %v1414_v9 = vpop.f32.mrf.mxu2  ;;  %v1388_v48 = vpop.f32.mrf.mxu0 }
 0x129   :  { %v1428_v51 = vpop.f32.mrf.mxu3  ;;  %v1415_v39 = vadd.f32 %v1414_v9, %v1401_v47  ;;  %v1389_v10 = vadd.f32 %v1388_v48, %v1375_v38  ;;  %v1402_v1 = vpop.f32.mrf.mxu1 }
 0x12b   :  { %v1429_v7 = vadd.f32 %v1428_v51, %v1415_v39  ;;  %v1403_v17 = vadd.f32 %v1402_v1, %v1389_v10 }
 0x12d   :  { %vm1435_vm2 = vcmp.ge.f32.partialorder %v1429_v7, 0.0  ;;  %v1440_v15 = vmul.f32 %v1438_v26, %v1429_v7 }
 0x12f   :  { %v1444_v16 = vsel %vm1435_vm2, %v1429_v7, %v1440_v15 }
 0x130   :  { %v1447_v31 = vpack.c.bf16 %v1444_v16, %v1443_v12  ;;  %v1416_v18 = vpop.f32.mrf.mxu2 }
 0x131   :  { %v1417_v19 = vadd.f32 %v1416_v18, %v1403_v17  ;;  %v1430_v8 = vpop.f32.mrf.mxu3 }
 0x132   :  { %1449 = vst [vmem:[%s3577_s3] sm:$0xff] %v1447_v31 }
 0x133   :  { %v1431_v20 = vadd.f32 %v1430_v8, %v1417_v19 }
 0x135   :  { %vm1437_vm4 = vcmp.ge.f32.partialorder %v1431_v20, 0.0  ;;  %v1442_v14 = vmul.f32 %v1438_v26, %v1431_v20 }
 0x137   :  { %v1446_v22 = vsel %vm1437_vm4, %v1431_v20, %v1442_v14 }
 0x138   :  { %v1448_v27 = vpack.c.bf16 %v1446_v22, %v1445_v21 }
 0x13a   :  { %1450 = vst [vmem:[%s3577_s3 + $0x8] sm:$0xff] %v1448_v27 }

</bundles_post_ra>
